<compile_context>
chip_gen: v5e
topology: v5e:2x2
jax: 0.10.0
libtpu: 0.0.40
codegen_flags: <defaults>
</compile_context>

<pallas_src>
import functools

import jax
import jax.numpy as jnp
from jax.experimental import pallas as pl
from jax.experimental.pallas import tpu as pltpu


_VMEM_LIMIT = 48 * 1024 * 1024   # > default scoped limit, < v7x 64 MiB physical VMEM


def _round_up(x, m):
    return (x + m - 1) // m * m


def _divisors(n):
    ds = set()
    d = 1
    while d * d <= n:
        if n % d == 0:
            ds.add(d)
            ds.add(n // d)
        d += 1
    return sorted(ds)


def _row_tile(n, row_bytes, budget=2 << 20, modulus=8):
    """Tile along a length-n axis: a divisor of n aligned to `modulus` (TPU (8,128)
    tiling), as large as fits `budget` bytes per block.  Falls back to the full extent
    only when no aligned divisor exists (tiny axes, where full-dim blocks are legal)."""
    cap = max(1, budget // max(row_bytes, 1))
    aligned = [d for d in _divisors(n) if d % modulus == 0]
    fitting = [d for d in aligned if d <= cap]
    if fitting:
        return max(fitting)
    if aligned:
        return min(aligned)
    return n


# ----------------------------------------------------------------------------
# Matmul tile helpers (tm/tn up to 512, tk >= 256 preferred)
# ----------------------------------------------------------------------------

def _mm_m_tile(m):
    for t in (512, 256, 128, 64, 32, 16, 8):
        if m % t == 0:
            return t, m
    if m <= 512:
        return m, m                       # full-extent block (allowed)
    mp = _round_up(m, 256)
    return 256, mp


def _mm_n_tile(n):
    for t in (512, 256, 128):
        if n % t == 0:
            return t, n
    if n <= 512:
        return n, n
    return 128, _round_up(n, 128)


def _mm_k_tile(k):
    for t in (512, 384, 256, 128):
        if k % t == 0:
            return t, k
    if k <= 2048:
        return k, k
    return 512, _round_up(k, 512)


# ----------------------------------------------------------------------------
# Pallas kernels
# ----------------------------------------------------------------------------

def _matmul_kernel(*refs, relu, has_bias, has_add):
    """bf16 x bf16 -> f32 accumulate; epilogue (bias, ReLU, then +skip) fused on last k.
    The skip is added AFTER the ReLU: matches `residual.add(block(x), skip)` in the
    PyTorch reference."""
    it = iter(refs)
    a_ref = next(it)
    b_ref = next(it)
    bias_ref = next(it) if has_bias else None
    add_ref = next(it) if has_add else None
    o_ref = next(it)
    acc_ref = next(it)

    @pl.when(pl.program_id(2) == 0)
    def _():
        acc_ref[...] = jnp.zeros_like(acc_ref)

    acc_ref[...] += jnp.dot(a_ref[...], b_ref[...],
                            preferred_element_type=jnp.float32)

    @pl.when(pl.program_id(2) == pl.num_programs(2) - 1)
    def _():
        y = acc_ref[...]
        if has_bias:
            y = y + bias_ref[...]
        if relu:
            y = jnp.maximum(y, 0.0)
        if has_add:
            y = y + add_ref[...].astype(jnp.float32)
        o_ref[...] = y.astype(o_ref.dtype)


def _rowdot_kernel(a_ref, w_ref, b_ref, o_ref):
    """(T,K) x (1,K) -> (T,1): single-output-channel 1x1 conv on the VPU (final conv)."""
    y = jnp.sum(a_ref[...].astype(jnp.float32) * w_ref[...], axis=-1, keepdims=True)
    o_ref[...] = y + b_ref[...]


def _ca_gate_kernel(x_ref, w1_ref, b1_ref, w2_ref, b2_ref, gate_ref,
                    avg_ref, max_ref, *, inv_hw):
    """Global avg+max pool over HW (accumulated across grid steps) fused with the CBAM
    channel-attention MLP: gate = sigmoid(MLP(avg) + MLP(max)), computed on last step."""
    t = pl.program_id(0)
    xs = x_ref[...].astype(jnp.float32)              # (N, T, C)
    psum = jnp.sum(xs, axis=1) * inv_hw
    pmax = jnp.max(xs, axis=1)

    @pl.when(t == 0)
    def _():
        avg_ref[...] = psum
        max_ref[...] = pmax

    @pl.when(t > 0)
    def _():
        avg_ref[...] = avg_ref[...] + psum
        max_ref[...] = jnp.maximum(max_ref[...], pmax)

    @pl.when(t == pl.num_programs(0) - 1)
    def _():
        w1 = w1_ref[...]
        b1 = b1_ref[...]
        w2 = w2_ref[...]
        b2 = b2_ref[...]

        def mlp(v):
            h = jnp.dot(v.astype(jnp.bfloat16), w1,
                        preferred_element_type=jnp.float32) + b1
            h = jnp.maximum(h, 0.0)
            return jnp.dot(h.astype(jnp.bfloat16), w2,
                           preferred_element_type=jnp.float32) + b2

        gate_ref[...] = jax.nn.sigmoid(mlp(avg_ref[...]) + mlp(max_ref[...]))


def _ca_stats_kernel(x_ref, g_ref, mean_ref, max_ref, *, inv_c):
    """Channel-attention gating applied in-register (the gated tensor xc never hits HBM);
    emits the channel-mean / channel-max maps that drive the spatial attention."""
    xc = x_ref[...].astype(jnp.float32) * g_ref[...]
    mean_ref[...] = (jnp.sum(xc, axis=-1, keepdims=True) * inv_c).astype(mean_ref.dtype)
    max_ref[...] = jnp.max(xc, axis=-1, keepdims=True).astype(max_ref.dtype)
    # TODO(synk): outputs are still lane-width-1 (bf16 halves the masked stores); a fully
    # lane-dense transposed layout needs a sublane->lane relayout after the C-reduction.


def _sa_conv7_kernel(mean_ref, max_ref, w_ref, o_ref, *, H, W):
    """CBAM spatial attention: 7x7 conv (pad 3) over [channel-mean, channel-max] planes,
    computed as a 98-tap stencil on VMEM-resident padded planes (no im2col, no (M,1) matmul)."""
    acc = jnp.zeros((H, W), jnp.float32)
    for i in range(7):
        for j in range(7):
            acc = acc + w_ref[i * 7 + j] * mean_ref[0, i:i + H, j:j + W]
            acc = acc + w_ref[49 + i * 7 + j] * max_ref[0, i:i + H, j:j + W]
    o_ref[0] = jax.nn.sigmoid(acc)


def _cbam_apply_kernel(x_ref, ca_ref, sa_ref, id_ref, o_ref):
    """out = relu(x * ca_gate * sa_gate + identity) -- fused CBAM tail + bottleneck residual."""
    y = x_ref[...].astype(jnp.float32) * ca_ref[...] * sa_ref[...]
    y = y + id_ref[...].astype(jnp.float32)
    o_ref[...] = jnp.maximum(y, 0.0).astype(o_ref.dtype)


def _max9_kernel(*refs):
    y = refs[0][...]
    for r in refs[1:9]:
        y = jnp.maximum(y, r[...])
    refs[9][...] = y


# ----------------------------------------------------------------------------
# Pallas wrappers
# ----------------------------------------------------------------------------

def pallas_matmul(a, b, bias=None, add=None, relu=False, out_dtype=jnp.bfloat16):
    """(M,K) @ (K,N), bf16 MXU operands, f32 accumulation, fused bias/ReLU/skip epilogue."""
    M, K = a.shape
    K2, N = b.shape
    assert K == K2
    a = a.astype(jnp.bfloat16)
    b = b.astype(jnp.bfloat16)

    tm, Mp = _mm_m_tile(M)
    tn, Np = _mm_n_tile(N)
    tk, Kp = _mm_k_tile(K)
    if (Mp, Kp) != (M, K):
        a = jnp.pad(a, ((0, Mp - M), (0, Kp - K)))
    if (Kp, Np) != (K, N):
        b = jnp.pad(b, ((0, Kp - K), (0, Np - N)))

    in_specs = [pl.BlockSpec((tm, tk), lambda i, j, k: (i, k)),
                pl.BlockSpec((tk, tn), lambda i, j, k: (k, j))]
    args = [a, b]
    has_bias = bias is not None
    has_add = add is not None
    if has_bias:
        bias2 = bias.reshape(1, N).astype(jnp.float32)
        if Np != N:
            bias2 = jnp.pad(bias2, ((0, 0), (0, Np - N)))
        in_specs.append(pl.BlockSpec((1, tn), lambda i, j, k: (0, j)))
        args.append(bias2)
    if has_add:
        add2 = add.astype(jnp.bfloat16)                 # skip stream read in bf16
        if (Mp, Np) != (M, N):
            add2 = jnp.pad(add2, ((0, Mp - M), (0, Np - N)))
        in_specs.append(pl.BlockSpec((tm, tn), lambda i, j, k: (i, j)))
        args.append(add2)

    out = pl.pallas_call(
        functools.partial(_matmul_kernel, relu=relu,
                          has_bias=has_bias, has_add=has_add),
        out_shape=jax.ShapeDtypeStruct((Mp, Np), out_dtype),
        grid=(Mp // tm, Np // tn, Kp // tk),
        in_specs=in_specs,
        out_specs=pl.BlockSpec((tm, tn), lambda i, j, k: (i, j)),
        scratch_shapes=[pltpu.VMEM((tm, tn), jnp.float32)],
        compiler_params=pltpu.CompilerParams(
            dimension_semantics=("parallel", "parallel", "arbitrary"),
            vmem_limit_bytes=_VMEM_LIMIT),
    )(*args)
    if (Mp, Np) != (M, N):
        out = out[:M, :N]
    return out


def pallas_rowdot(a, w, bias):
    """(M,K) bf16 x (1,K) f32 -> (M,1) f32."""
    M, K = a.shape
    T = _row_tile(M, 2 * K, budget=2 << 20)
    return pl.pallas_call(
        _rowdot_kernel,
        out_shape=jax.ShapeDtypeStruct((M, 1), jnp.float32),
        grid=(M // T,),
        in_specs=[pl.BlockSpec((T, K), lambda i: (i, 0)),
                  pl.BlockSpec((1, K), lambda i: (0, 0)),
                  pl.BlockSpec((1, 1), lambda i: (0, 0))],
        out_specs=pl.BlockSpec((T, 1), lambda i: (i, 0)),
        compiler_params=pltpu.CompilerParams(
            dimension_semantics=("parallel",), vmem_limit_bytes=_VMEM_LIMIT),
    )(a.astype(jnp.bfloat16), w.reshape(1, K).astype(jnp.float32),
      bias.reshape(1, 1).astype(jnp.float32))


def ca_gate_op(x3d, w1, b1, w2, b2):
    """(N,HW,C) bf16 -> CBAM channel gate sigmoid(MLP(avg)+MLP(max)), shape (N,C) f32."""
    N, HW, C = x3d.shape
    r = w1.shape[1]
    T = _row_tile(HW, 2 * N * C, budget=2 << 20)
    return pl.pallas_call(
        functools.partial(_ca_gate_kernel, inv_hw=1.0 / HW),
        out_shape=jax.ShapeDtypeStruct((N, C), jnp.float32),
        grid=(HW // T,),
        in_specs=[pl.BlockSpec((N, T, C), lambda i: (0, i, 0)),
                  pl.BlockSpec((C, r), lambda i: (0, 0)),
                  pl.BlockSpec((1, r), lambda i: (0, 0)),
                  pl.BlockSpec((r, C), lambda i: (0, 0)),
                  pl.BlockSpec((1, C), lambda i: (0, 0))],
        out_specs=pl.BlockSpec((N, C), lambda i: (0, 0)),
        scratch_shapes=[pltpu.VMEM((N, C), jnp.float32),
                        pltpu.VMEM((N, C), jnp.float32)],
        compiler_params=pltpu.CompilerParams(
            dimension_semantics=("arbitrary",), vmem_limit_bytes=_VMEM_LIMIT),
    )(x3d, w1, b1, w2, b2)


def ca_stats_op(x3d, gate):
    """Channel-mean / channel-max maps of the channel-gated features (bf16, no xc write)."""
    N, HW, C = x3d.shape
    T = _row_tile(HW, 2 * N * C, budget=2 << 20)
    return pl.pallas_call(
        functools.partial(_ca_stats_kernel, inv_c=1.0 / C),
        out_shape=(jax.ShapeDtypeStruct((N, HW, 1), jnp.bfloat16),
                   jax.ShapeDtypeStruct((N, HW, 1), jnp.bfloat16)),
        grid=(HW // T,),
        in_specs=[pl.BlockSpec((N, T, C), lambda i: (0, i, 0)),
                  pl.BlockSpec((N, 1, C), lambda i: (0, 0, 0))],
        out_specs=(pl.BlockSpec((N, T, 1), lambda i: (0, i, 0)),
                   pl.BlockSpec((N, T, 1), lambda i: (0, i, 0))),
        compiler_params=pltpu.CompilerParams(
            dimension_semantics=("parallel",), vmem_limit_bytes=_VMEM_LIMIT),
    )(x3d, gate)


def sa_conv7_op(mean_map, max_map, w98):
    """7x7/pad3 spatial-attention conv over (N,H,W) mean/max planes -> sigmoid gate (N,H,W)."""
    N, H, W = mean_map.shape
    pm = jnp.pad(mean_map, ((0, 0), (3, 3), (3, 3)))
    px = jnp.pad(max_map, ((0, 0), (3, 3), (3, 3)))
    Hp, Wp = H + 6, W + 6
    return pl.pallas_call(
        functools.partial(_sa_conv7_kernel, H=H, W=W),
        out_shape=jax.ShapeDtypeStruct((N, H, W), jnp.float32),
        grid=(N,),
        in_specs=[pl.BlockSpec((1, Hp, Wp), lambda n: (n, 0, 0)),
                  pl.BlockSpec((1, Hp, Wp), lambda n: (n, 0, 0)),
                  pl.BlockSpec(memory_space=pltpu.MemorySpace.SMEM)],
        out_specs=pl.BlockSpec((1, H, W), lambda n: (n, 0, 0)),
        compiler_params=pltpu.CompilerParams(
            dimension_semantics=("parallel",), vmem_limit_bytes=_VMEM_LIMIT),
    )(pm, px, w98)


def cbam_apply_op(x3d, ca, sa, identity):
    """out = relu(x * ca * sa + identity), tiled over HW, bf16 in/out."""
    N, HW, C = x3d.shape
    T = _row_tile(HW, 6 * N * C, budget=4 << 20)
    return pl.pallas_call(
        _cbam_apply_kernel,
        out_shape=jax.ShapeDtypeStruct((N, HW, C), jnp.bfloat16),
        grid=(HW // T,),
        in_specs=[pl.BlockSpec((N, T, C), lambda i: (0, i, 0)),
                  pl.BlockSpec((N, 1, C), lambda i: (0, 0, 0)),
                  pl.BlockSpec((N, T, 1), lambda i: (0, i, 0)),
                  pl.BlockSpec((N, T, C), lambda i: (0, i, 0))],
        out_specs=pl.BlockSpec((N, T, C), lambda i: (0, i, 0)),
        compiler_params=pltpu.CompilerParams(
            dimension_semantics=("parallel",), vmem_limit_bytes=_VMEM_LIMIT),
    )(x3d, ca, sa, identity)


def max9_op(planes):
    """Elementwise max of 9 (M,C) bf16 planes (3x3/s2 maxpool reduction)."""
    M, C = planes[0].shape
    T = _row_tile(M, 2 * C, budget=512 << 10)
    spec = pl.BlockSpec((T, C), lambda i: (i, 0))
    return pl.pallas_call(
        _max9_kernel,
        out_shape=jax.ShapeDtypeStruct((M, C), planes[0].dtype),
        grid=(M // T,),
        in_specs=[spec] * 9,
        out_specs=spec,
        compiler_params=pltpu.CompilerParams(
            dimension_semantics=("parallel",), vmem_limit_bytes=_VMEM_LIMIT),
    )(*planes)


# ----------------------------------------------------------------------------
# NN ops (im2col / interleave glue stays in XLA)
# ----------------------------------------------------------------------------

def _extract_patches(x, kh, kw, stride, pad):
    # TODO(synk): patches are materialized by XLA slicing; tap-streaming inside the matmul
    # K-grid requires manual-DMA shifted windows (not expressible via BlockSpec index_maps).
    N, H, W, C = x.shape
    xp = jnp.pad(x, ((0, 0), (pad, pad), (pad, pad), (0, 0)))
    Ho = (H + 2 * pad - kh) // stride + 1
    Wo = (W + 2 * pad - kw) // stride + 1
    cols = []
    for i in range(kh):
        for j in range(kw):
            cols.append(xp[:, i:i + stride * Ho:stride, j:j + stride * Wo:stride, :])
    return jnp.concatenate(cols, axis=-1), Ho, Wo        # (N, Ho, Wo, kh*kw*C)


def conv2d(x, cw, k, stride=1, padding=0, relu=False, add=None, out_dtype=jnp.bfloat16):
    """x: NHWC bf16; cw: dict(w=(k*k*Cin,Cout) bf16, b=(Cout,) f32) with BN pre-folded."""
    N, H, W, Cin = x.shape
    if k == 1 and padding == 0:
        xs = x[:, ::stride, ::stride, :] if stride > 1 else x
        Ho, Wo = xs.shape[1], xs.shape[2]
        a = xs.reshape(N * Ho * Wo, Cin)
    else:
        patches, Ho, Wo = _extract_patches(x, k, k, stride, padding)
        a = patches.reshape(N * Ho * Wo, k * k * Cin)
    cout = cw["w"].shape[1]
    y = pallas_matmul(a, cw["w"], bias=cw["b"], relu=relu, add=add, out_dtype=out_dtype)
    return y.reshape(N, Ho, Wo, cout)


def conv_transpose2x2(x, w_mat):
    """ConvTranspose2d(k=2, s=2, bias=False) as matmul + bf16 pixel interleave."""
    # TODO(synk): the 2x2 sub-pixel interleave is one XLA transpose (bf16) instead of being
    # folded into the following conv's gather.
    N, H, W, Cin = x.shape
    cout = w_mat.shape[1] // 4
    a = x.reshape(N * H * W, Cin)
    y = pallas_matmul(a, w_mat).reshape(N, H, W, 2, 2, cout)
    y = jnp.transpose(y, (0, 1, 3, 2, 4, 5)).reshape(N, 2 * H, 2 * W, cout)
    return y


def maxpool3x3s2(x):
    # TODO(synk): still 9 XLA-materialized shifted planes (bf16) reduced by a Pallas kernel;
    # a single overlapping-window kernel needs manual-DMA windows.
    N, H, W, C = x.shape
    Ho = (H + 2 - 3) // 2 + 1
    Wo = (W + 2 - 3) // 2 + 1
    xp = jnp.pad(x, ((0, 0), (1, 1), (1, 1), (0, 0)), constant_values=-jnp.inf)
    planes = [xp[:, i:i + 2 * Ho:2, j:j + 2 * Wo:2, :].reshape(N * Ho * Wo, C)
              for i in range(3) for j in range(3)]
    return max9_op(planes).reshape(N, Ho, Wo, C)


# ----------------------------------------------------------------------------
# CBAM-ResNet50 encoder + UNet decoder
# ----------------------------------------------------------------------------

def bottleneck_forward(p, x, stride):
    out = conv2d(x, p["conv1"], k=1, relu=True)
    out = conv2d(out, p["conv2"], k=3, stride=stride, padding=1, relu=True)
    out = conv2d(out, p["conv3"], k=1, relu=False)

    N, H, W, C = out.shape
    x2 = out.reshape(N, H * W, C)

    # Channel attention: fused global avg+max pool + shared MLP + sigmoid (one kernel).
    ca = ca_gate_op(x2, p["ca_w1"], p["ca_b1"], p["ca_w2"], p["ca_b2"]).reshape(N, 1, C)

    # Channel mean/max of the gated features (gating done in-register, no xc round trip).
    cmean, cmax = ca_stats_op(x2, ca)

    # Spatial attention: 7x7 stencil over the two small maps.
    sa = sa_conv7_op(cmean.reshape(N, H, W), cmax.reshape(N, H, W), p["sa_w"])
    sa = sa.reshape(N, H * W, 1)

    if "down" in p:
        identity = conv2d(x, p["down"], k=1, stride=stride, relu=False)
    else:
        identity = x
    identity = identity.reshape(N, H * W, C)

    y = cbam_apply_op(x2, ca, sa, identity)          # relu(x*ca*sa + identity)
    return y.reshape(N, H, W, C)


def decoder_block_forward(p, x, skip=None):
    y = conv_transpose2x2(x, p["tconv_w"])
    add = None if skip is None else skip.reshape(-1, skip.shape[-1])
    # Skip added AFTER BN+ReLU (matches residual.add(block(x), skip) in the reference).
    return conv2d(y, p["conv"], k=3, padding=1, relu=True, add=add)


def cbam_resnet50_unet_forward(params, x_nchw):
    x = jnp.transpose(x_nchw, (0, 2, 3, 1)).astype(jnp.bfloat16)   # NCHW -> NHWC, bf16
    enc = params["enc"]

    x1 = conv2d(x, enc["stem"], k=7, stride=2, padding=3, relu=True)
    y = maxpool3x3s2(x1)
    skips = []
    for name, s in (("layer1", 1), ("layer2", 2), ("layer3", 2), ("layer4", 2)):
        for bi, blk in enumerate(enc[name]):
            y = bottleneck_forward(blk, y, stride=s if bi == 0 else 1)
        skips.append(y)
    x2, x3, x4, x5 = skips

    out = decoder_block_forward(params["block1"], x5, skip=x4)
    out = decoder_block_forward(params["block2"], out, skip=x3)
    out = decoder_block_forward(params["block3"], out, skip=x2)
    out = decoder_block_forward(params["block4"], out, skip=x1)
    out = decoder_block_forward(params["block5"], out, skip=None)

    # final 1x1 conv (with bias), f32 output
    N, H, W, Cf = out.shape
    cout = params["final_w"].shape[1]
    if cout == 1:
        y = pallas_rowdot(out.reshape(N * H * W, Cf), params["final_w"].T,
                          params["final_b"]).reshape(N, H, W, 1)
    else:
        y = pallas_matmul(out.reshape(N * H * W, Cf), params["final_w"],
                          bias=params["final_b"],
                          out_dtype=jnp.float32).reshape(N, H, W, cout)
    return jnp.transpose(y, (0, 3, 1, 2)).astype(jnp.float32)      # NHWC -> NCHW


# ----------------------------------------------------------------------------
# Deterministic parameter initialization (synthetic -- no checkpoint loading)
# ----------------------------------------------------------------------------

class _Rng:
    def __init__(self, seed=0):
        self.key = jax.random.PRNGKey(seed)

    def next(self):
        self.key, k = jax.random.split(self.key)
        return k


def _conv_w(rng, cout, cin, k):
    std = (2.0 / (cin * k * k)) ** 0.5
    return std * jax.random.normal(rng.next(), (cout, cin, k, k), jnp.float32)


def _tconv_w(rng, cin, cout):
    std = (2.0 / cin) ** 0.5
    return std * jax.random.normal(rng.next(), (cin, cout, 2, 2), jnp.float32)


def _lin(rng, cin, cout):
    std = (2.0 / cin) ** 0.5
    w = std * jax.random.normal(rng.next(), (cin, cout), jnp.float32)
    return w, jnp.zeros((1, cout), jnp.float32)


def _bn(c):
    return dict(gamma=jnp.ones((c,), jnp.float32),
                beta=jnp.zeros((c,), jnp.float32),
                mean=jnp.zeros((c,), jnp.float32),
                var=jnp.ones((c,), jnp.float32))


def _fold_conv_bn(w, bn, eps=1e-5):
    """Fold inference BatchNorm into conv weight (bf16 matmul layout) + f32 bias."""
    scale = bn["gamma"] / jnp.sqrt(bn["var"] + eps)
    wf = w * scale[:, None, None, None]
    b = bn["beta"] - bn["mean"] * scale
    cout, cin, kh, kw = w.shape
    wm = jnp.transpose(wf, (2, 3, 1, 0)).reshape(kh * kw * cin, cout).astype(jnp.bfloat16)
    return dict(w=wm, b=b.astype(jnp.float32))


def init_cbam_resnet50_unet(in_channels=4, out_channels=1, seed=0):
    rng = _Rng(seed)
    enc = {"stem": _fold_conv_bn(_conv_w(rng, 64, in_channels, 7), _bn(64))}

    def make_layer(inplanes, planes, nblocks, stride):
        blocks = []
        for b in range(nblocks):
            s = stride if b == 0 else 1
            ip = inplanes if b == 0 else planes * 4
            c = planes * 4
            blk = dict(
                conv1=_fold_conv_bn(_conv_w(rng, planes, ip, 1), _bn(planes)),
                conv2=_fold_conv_bn(_conv_w(rng, planes, planes, 3), _bn(planes)),
                conv3=_fold_conv_bn(_conv_w(rng, c, planes, 1), _bn(c)),
            )
            r = max(c // 16, 1)
            w1, b1 = _lin(rng, c, r)
            w2, b2 = _lin(rng, r, c)
            blk.update(ca_w1=w1.astype(jnp.bfloat16), ca_b1=b1,
                       ca_w2=w2.astype(jnp.bfloat16), ca_b2=b2)
            sw = _conv_w(rng, 1, 2, 7)                   # CBAM spatial 7x7, [mean, max] -> 1
            blk["sa_w"] = sw.reshape(98).astype(jnp.float32)
            if s != 1 or ip != c:
                blk["down"] = _fold_conv_bn(_conv_w(rng, c, ip, 1), _bn(c))
            blocks.append(blk)
        return blocks

    enc["layer1"] = make_layer(64, 64, 3, 1)
    enc["layer2"] = make_layer(256, 128, 4, 2)
    enc["layer3"] = make_layer(512, 256, 6, 2)
    enc["layer4"] = make_layer(1024, 512, 3, 2)

    def dec_block(cin, cout):
        tw = _tconv_w(rng, cin, cout)
        twm = jnp.transpose(tw, (0, 2, 3, 1)).reshape(cin, 4 * cout).astype(jnp.bfloat16)
        return dict(tconv_w=twm,
                    conv=_fold_conv_bn(_conv_w(rng, cout, cout, 3), _bn(cout)))

    final_w = _conv_w(rng, out_channels, 64, 1).reshape(out_channels, 64).T   # (64, Cout)
    return dict(enc=enc,
                block1=dec_block(2048, 1024),
                block2=dec_block(1024, 512),
                block3=dec_block(512, 256),
                block4=dec_block(256, 64),
                block5=dec_block(64, 64),
                final_w=final_w,
                final_b=jnp.zeros((out_channels,), jnp.float32))


# ----------------------------------------------------------------------------

if __name__ == "__main__":
    key = jax.random.PRNGKey(0)
    # 32x32 is the smallest spatial size that survives the ResNet50 /32 downsampling.
    x = jax.random.normal(key, (2, 4, 32, 32), jnp.float32)       # NCHW, like PyTorch

    params = init_cbam_resnet50_unet(in_channels=4, out_channels=1, seed=0)
    out = cbam_resnet50_unet_forward(params, x)
    out = jax.block_until_ready(out)

    assert out.shape == (2, 1, 32, 32), out.shape
    assert bool(jnp.all(jnp.isfinite(out)))
    print("KERNEL_OK")
</pallas_src>

<mosaic_0001>
module attributes {stable_mosaic.version = 11 : i64} {
  func.func @_matmul_kernel(%arg0: i32, %arg1: i32, %arg2: i32, %arg3: memref<512x196xbf16, #tpu.memory_space<vmem>>, %arg4: memref<196x64xbf16, #tpu.memory_space<vmem>>, %arg5: memref<1x64xf32, #tpu.memory_space<vmem>>, %arg6: memref<512x64xbf16, #tpu.memory_space<vmem>>, %arg7: memref<512x64xf32, #tpu.memory_space<vmem>>) attributes {dimension_semantics = [#tpu.dimension_semantics<parallel>, #tpu.dimension_semantics<parallel>, #tpu.dimension_semantics<arbitrary>], iteration_bounds = array<i64: 1, 1, 1>, scalar_prefetch = 0 : i64, scratch_operands = 1 : i64, tpu.core_type = #tpu.core_type<tc>, window_params = [{transform_indices = @transform_0, window_bounds = array<i64: 512, 196>}, {transform_indices = @transform_1, window_bounds = array<i64: 196, 64>}, {transform_indices = @transform_2, window_bounds = array<i64: 1, 64>}, {transform_indices = @transform_3, window_bounds = array<i64: 512, 64>}]} {
    %c0_i32 = arith.constant 0 : i32
    %0 = arith.cmpi eq, %arg2, %c0_i32 : i32
    %1 = arith.extui %0 : i1 to i32
    %c0_i32_0 = arith.constant 0 : i32
    %2 = arith.cmpi ne, %1, %c0_i32_0 : i32
    scf.if %2 {
      %cst_10 = arith.constant 0.000000e+00 : f32
      %12 = vector.broadcast %cst_10 : f32 to vector<512x64xf32>
      %c0_11 = arith.constant 0 : index
      %c0_12 = arith.constant 0 : index
      %13 = vector.load %arg7[%c0_11, %c0_12] : memref<512x64xf32, #tpu.memory_space<vmem>>, vector<512x64xf32>
      tpu.vector_store %arg7[%c0_11, %c0_12], %12 {strides = array<i32>} : memref<512x64xf32, #tpu.memory_space<vmem>>, vector<512x64xf32>,
    } else {
    }
    %c0 = arith.constant 0 : index
    %c0_1 = arith.constant 0 : index
    %3 = vector.load %arg7[%c0, %c0_1] : memref<512x64xf32, #tpu.memory_space<vmem>>, vector<512x64xf32>
    %c0_2 = arith.constant 0 : index
    %c0_3 = arith.constant 0 : index
    %4 = vector.load %arg3[%c0_2, %c0_3] : memref<512x196xbf16, #tpu.memory_space<vmem>>, vector<512x196xbf16>
    %c0_4 = arith.constant 0 : index
    %c0_5 = arith.constant 0 : index
    %5 = vector.load %arg4[%c0_4, %c0_5] : memref<196x64xbf16, #tpu.memory_space<vmem>>, vector<196x64xbf16>
    %cst = arith.constant dense<0.000000e+00> : vector<512x64xf32>
    %6 = tpu.matmul %4, %5, %cst {dimension_numbers = #tpu.dot_dimension_numbers<[1], [0], [0], [1], [0, 0, 1, 1], [], []>} : vector<512x196xbf16>, vector<196x64xbf16>, vector<512x64xf32> -> vector<512x64xf32>
    %7 = arith.addf %3, %6 : vector<512x64xf32>
    %c0_6 = arith.constant 0 : index
    %c0_7 = arith.constant 0 : index
    %8 = vector.load %arg7[%c0_6, %c0_7] : memref<512x64xf32, #tpu.memory_space<vmem>>, vector<512x64xf32>
    tpu.vector_store %arg7[%c0_6, %c0_7], %7 {strides = array<i32>} : memref<512x64xf32, #tpu.memory_space<vmem>>, vector<512x64xf32>,
    %c0_i32_8 = arith.constant 0 : i32
    %9 = arith.cmpi eq, %arg2, %c0_i32_8 : i32
    %10 = arith.extui %9 : i1 to i32
    %c0_i32_9 = arith.constant 0 : i32
    %11 = arith.cmpi ne, %10, %c0_i32_9 : i32
    scf.if %11 {
      %c0_10 = arith.constant 0 : index
      %c0_11 = arith.constant 0 : index
      %12 = vector.load %arg7[%c0_10, %c0_11] : memref<512x64xf32, #tpu.memory_space<vmem>>, vector<512x64xf32>
      %c0_12 = arith.constant 0 : index
      %c0_13 = arith.constant 0 : index
      %13 = vector.load %arg5[%c0_12, %c0_13] : memref<1x64xf32, #tpu.memory_space<vmem>>, vector<1x64xf32>
      %14 = vector.broadcast %13 : vector<1x64xf32> to vector<512x64xf32>
      %15 = arith.addf %12, %14 : vector<512x64xf32>
      %cst_14 = arith.constant 0.000000e+00 : f32
      %16 = vector.broadcast %cst_14 : f32 to vector<512x64xf32>
      %17 = arith.maximumf %15, %16 : vector<512x64xf32>
      %18 = arith.truncf %17 : vector<512x64xf32> to vector<512x64xbf16>
      %c0_15 = arith.constant 0 : index
      %c0_16 = arith.constant 0 : index
      %19 = vector.load %arg6[%c0_15, %c0_16] : memref<512x64xbf16, #tpu.memory_space<vmem>>, vector<512x64xbf16>
      tpu.vector_store %arg6[%c0_15, %c0_16], %18 {strides = array<i32>} : memref<512x64xbf16, #tpu.memory_space<vmem>>, vector<512x64xbf16>,
    } else {
    }
    return
  }
  func.func @transform_0(%arg0: i32, %arg1: i32, %arg2: i32) -> (i32, i32) {
    %c0_i32 = arith.constant 0 : i32
    return %arg0, %arg2 : i32, i32
  }
  func.func @transform_1(%arg0: i32, %arg1: i32, %arg2: i32) -> (i32, i32) {
    %c0_i32 = arith.constant 0 : i32
    return %arg2, %arg1 : i32, i32
  }
  func.func @transform_2(%arg0: i32, %arg1: i32, %arg2: i32) -> (i32, i32) {
    %c0_i32 = arith.constant 0 : i32
    %c0_i32_0 = arith.constant 0 : i32
    return %c0_i32, %arg1 : i32, i32
  }
  func.func @transform_3(%arg0: i32, %arg1: i32, %arg2: i32) -> (i32, i32) {
    %c0_i32 = arith.constant 0 : i32
    return %arg0, %arg1 : i32, i32
  }
}

</mosaic_0001>

<bundles_post_ra>
// kernel: tpu_custom_call.1
= control target key start
LH: loop header
LB: loop body
LE: loop exit
PB: predicated region body
PF: predicated region fallthrough
CT: control target
= control target key end

     0   :  { %vm697_vm0 = vcmask 1041408   ;;  %vm600_vm1 = vcmask 556032   ;;  %vm19_vm2 = vcmask 523264   ;;  %vm1431_vm3 = vcmask 519168   ;;  %s2980_s1 = inlined_call_operand.vmem [shape: bf16[196,64], index: 1, kind: input, shape index: {}]   ;;  %s2981_s0 = inlined_call_operand.vmem [shape: bf16[512,196], index: 0, kind: input, shape index: {}]   ;;  %s2982_s2 = inlined_call_operand.vmem [shape: f32[1,64], index: 2, kind: input, shape index: {}]   ;;  %s2983_s3 = inlined_call_operand.vmem [shape: bf16[512,64], index: 3, kind: output, shape index: {}]  }
   0x1   :  { %v1907_v0 = vld [vmem:[%s2980_s1 + $0x38] sm:$0xff]  ;;  %v236_v1 = vld [vmem:[%s2980_s1 + $0x60] sm:$0x3]  ;;  %v1906_v3 = vld [vmem:[%s2980_s1 + $0x30] sm:$0xff] }
   0x2   :  { %v574_v2 = vunpack.c.l.b16 %v236_v1  ;;  %701 = vmatpush.bf16.msra.mxu0 %v1907_v0  ;;  %1912 = vmatpush.bf16.msra.mxu2 %v1907_v0  ;;  %v1911_v6 = vld [vmem:[%s2980_s1 + $0x58] sm:$0xff]  ;;  %v1905_v7 = vld [vmem:[%s2980_s1 + $0x28] sm:$0xff]  ;;  %v1910_v8 = vld [vmem:[%s2980_s1 + $0x50] sm:$0xff] }
   0x3   :  { %v1904_v9 = vld [vmem:[%s2980_s1 + $0x20] sm:$0xff]  ;;  %v1909_v10 = vld [vmem:[%s2980_s1 + $0x48] sm:$0xff]  ;;  %v1903_v11 = vld [vmem:[%s2980_s1 + $0x18] sm:$0xff] }
   0x4   :  { %v587_v4 = vpack.c.b16 %v574_v2, %v574_v2  ;;  %v1908_v12 = vld [vmem:[%s2980_s1 + $0x40] sm:$0xff]  ;;  %v1902_v13 = vld [vmem:[%s2980_s1 + $0x10] sm:$0xff]  ;;  %v1504_v15 = vld [vmem:[%s2981_s0 + $0x8] sm:$0xf0] }
   0x5   :  { %v1836_v14 = vld [vmem:[%s2981_s0 + $0x4] sm:$0xf]  ;;  %v1870_v16 = vld [vmem:[%s2981_s0 + $0x114] sm:$0xf]  ;;  %v1640_v17 = vld [vmem:[%s2981_s0 + $0x118] sm:$0xf0] }
   0x6   :  { %v699_v5 = vsel %vm697_vm0, %v587_v4, 0  ;;  %702 = vmatpush.bf16.msra.mxu0 %v1906_v3  ;;  %1913 = vmatpush.bf16.msra.mxu2 %v1906_v3  ;;  %v1507_v18 = vor.u32 %v1836_v14, %v1504_v15  ;;  %v1901_v19 = vld [vmem:[%s2980_s1 + $0x8] sm:$0xff]  ;;  %v1643_v20 = vor.u32 %v1870_v16, %v1640_v17  ;;  %v1900_v21 = vld [vmem:[%s2980_s1] sm:$0xff]  ;;  %v1838_v28 = vld [vmem:[%s2981_s0 + $0x14] sm:$0xf] }
   0x7   :  { %873 = vmatpush.bf16.msra.mxu1 %v699_v5  ;;  %1920 = vmatpush.bf16.msra.mxu3 %v699_v5  ;;  %v1502_v22 = vld [vmem:[%s2981_s0] sm:$0xf]  ;;  %v1837_v23 = vld [vmem:[%s2981_s0 + $0x4] sm:$0xf0]  ;;  %v1512_v29 = vld [vmem:[%s2981_s0 + $0x18] sm:$0xf0] }
   0x8   :  { %v1630_v24 = vld [vmem:[%s2981_s0 + $0x100] sm:$0xf]  ;;  %v1869_v25 = vld [vmem:[%s2981_s0 + $0x104] sm:$0xf0]  ;;  %v1503_v26 = vor.u32 %v1837_v23, %v1502_v22  ;;  %v1872_v30 = vld [vmem:[%s2981_s0 + $0x124] sm:$0xf]  ;;  %v1515_v32 = vor.u32 %v1838_v28, %v1512_v29 }
   0x9   :  { %v1631_v27 = vor.u32 %v1869_v25, %v1630_v24  ;;  %v1648_v31 = vld [vmem:[%s2981_s0 + $0x128] sm:$0xf0]  ;;  %v1510_v34 = vld [vmem:[%s2981_s0 + $0x10] sm:$0xf]  ;;  %v1839_v35 = vld [vmem:[%s2981_s0 + $0x14] sm:$0xf0] }
   0xa   :  { %703 = vmatpush.bf16.msra.mxu0 %v1905_v7  ;;  %1914 = vmatpush.bf16.msra.mxu2 %v1905_v7  ;;  %v1651_v33 = vor.u32 %v1872_v30, %v1648_v31  ;;  %v1638_v36 = vld [vmem:[%s2981_s0 + $0x110] sm:$0xf]  ;;  %v1871_v37 = vld [vmem:[%s2981_s0 + $0x114] sm:$0xf0]  ;;  %v1511_v38 = vor.u32 %v1839_v35, %v1510_v34  ;;  %v1840_v40 = vld [vmem:[%s2981_s0 + $0x24] sm:$0xf] }
   0xb   :  { %874 = vmatpush.bf16.msra.mxu1 %v1911_v6  ;;  %1921 = vmatpush.bf16.msra.mxu3 %v1911_v6  ;;  %v1639_v39 = vor.u32 %v1871_v37, %v1638_v36  ;;  %v1520_v41 = vld [vmem:[%s2981_s0 + $0x28] sm:$0xf0]  ;;  %v1874_v42 = vld [vmem:[%s2981_s0 + $0x134] sm:$0xf]  ;;  %v1656_v43 = vld [vmem:[%s2981_s0 + $0x138] sm:$0xf0] }
   0xc   :  { %v1523_v44 = vor.u32 %v1840_v40, %v1520_v41  ;;  %v1659_v45 = vor.u32 %v1874_v42, %v1656_v43  ;;  %v1518_v46 = vld [vmem:[%s2981_s0 + $0x20] sm:$0xf]  ;;  %v1841_v47 = vld [vmem:[%s2981_s0 + $0x24] sm:$0xf0]  ;;  %v1842_v52 = vld [vmem:[%s2981_s0 + $0x34] sm:$0xf] }
   0xd   :  { %v1646_v48 = vld [vmem:[%s2981_s0 + $0x120] sm:$0xf]  ;;  %v1873_v49 = vld [vmem:[%s2981_s0 + $0x124] sm:$0xf0]  ;;  %v1519_v50 = vor.u32 %v1841_v47, %v1518_v46  ;;  %v1528_v53 = vld [vmem:[%s2981_s0 + $0x38] sm:$0xf0] }
   0xe   :  { %704 = vmatpush.bf16.msra.mxu0 %v1904_v9  ;;  %1915 = vmatpush.bf16.msra.mxu2 %v1904_v9  ;;  %v1647_v51 = vor.u32 %v1873_v49, %v1646_v48  ;;  %v1876_v54 = vld [vmem:[%s2981_s0 + $0x144] sm:$0xf]  ;;  %v1664_v55 = vld [vmem:[%s2981_s0 + $0x148] sm:$0xf0]  ;;  %v1531_v56 = vor.u32 %v1842_v52, %v1528_v53  ;;  %v1526_v58 = vld [vmem:[%s2981_s0 + $0x30] sm:$0xf] }
   0xf   :  { %875 = vmatpush.bf16.msra.mxu1 %v1910_v8  ;;  %1922 = vmatpush.bf16.msra.mxu3 %v1910_v8  ;;  %v1667_v57 = vor.u32 %v1876_v54, %v1664_v55  ;;  %v1843_v59 = vld [vmem:[%s2981_s0 + $0x34] sm:$0xf0]  ;;  %v1654_v60 = vld [vmem:[%s2981_s0 + $0x130] sm:$0xf]  ;;  %v1844_v0 = vld [vmem:[%s2981_s0 + $0x44] sm:$0xf] }
  0x10   :  { %v1875_v61 = vld [vmem:[%s2981_s0 + $0x134] sm:$0xf0]  ;;  %v1527_v62 = vor.u32 %v1843_v59, %v1526_v58  ;;  %v1536_v1 = vld [vmem:[%s2981_s0 + $0x48] sm:$0xf0]  ;;  %v1878_v2 = vld [vmem:[%s2981_s0 + $0x154] sm:$0xf] }
  0x11   :  { %v1655_v63 = vor.u32 %v1875_v61, %v1654_v60  ;;  %v1672_v3 = vld [vmem:[%s2981_s0 + $0x158] sm:$0xf0]  ;;  %v1539_v4 = vor.u32 %v1844_v0, %v1536_v1  ;;  %v1534_v6 = vld [vmem:[%s2981_s0 + $0x40] sm:$0xf]  ;;  %v1845_v7 = vld [vmem:[%s2981_s0 + $0x44] sm:$0xf0] }
  0x12   :  { %705 = vmatpush.bf16.msra.mxu0 %v1903_v11  ;;  %1916 = vmatpush.bf16.msra.mxu2 %v1903_v11  ;;  %v1675_v5 = vor.u32 %v1878_v2, %v1672_v3  ;;  %v1662_v8 = vld [vmem:[%s2981_s0 + $0x140] sm:$0xf]  ;;  %v1877_v9 = vld [vmem:[%s2981_s0 + $0x144] sm:$0xf0]  ;;  %v1880_v14 = vld [vmem:[%s2981_s0 + $0x164] sm:$0xf] }
  0x13   :  { %876 = vmatpush.bf16.msra.mxu1 %v1909_v10  ;;  %1923 = vmatpush.bf16.msra.mxu3 %v1909_v10  ;;  %v1535_v10 = vor.u32 %v1845_v7, %v1534_v6  ;;  %v1663_v11 = vor.u32 %v1877_v9, %v1662_v8  ;;  %v1680_v15 = vld [vmem:[%s2981_s0 + $0x168] sm:$0xf0]  ;;  %v1848_v24 = vld [vmem:[%s2981_s0 + $0x64] sm:$0xf]  ;;  %v1550_v30 = vld [vmem:[%s2981_s0 + $0x60] sm:$0xf] }
  0x14   :  { %v1683_v17 = vor.u32 %v1880_v14, %v1680_v15  ;;  %v1552_v25 = vld [vmem:[%s2981_s0 + $0x68] sm:$0xf0]  ;;  %v1849_v31 = vld [vmem:[%s2981_s0 + $0x64] sm:$0xf0]  ;;  %v1850_v37 = vld [vmem:[%s2981_s0 + $0x74] sm:$0xf] }
  0x15   :  { %v1555_v28 = vor.u32 %v1848_v24, %v1552_v25  ;;  %v1881_v34 = vld [vmem:[%s2981_s0 + $0x164] sm:$0xf0]  ;;  %v1551_v35 = vor.u32 %v1849_v31, %v1550_v30  ;;  %v1696_v40 = vld [vmem:[%s2981_s0 + $0x188] sm:$0xf0]  ;;  %v1558_v43 = vld [vmem:[%s2981_s0 + $0x70] sm:$0xf] }
  0x16   :  { %706 = vmatpush.bf16.msra.mxu0 %v1902_v13  ;;  %1917 = vmatpush.bf16.msra.mxu2 %v1902_v13  ;;  %v1544_v13 = vld [vmem:[%s2981_s0 + $0x58] sm:$0xf0]  ;;  %v1883_v46 = vld [vmem:[%s2981_s0 + $0x174] sm:$0xf0]  ;;  %v1852_v49 = vld [vmem:[%s2981_s0 + $0x84] sm:$0xf] }
  0x17   :  { %877 = vmatpush.bf16.msra.mxu1 %v1908_v12  ;;  %1924 = vmatpush.bf16.msra.mxu3 %v1908_v12  ;;  %v1846_v12 = vld [vmem:[%s2981_s0 + $0x54] sm:$0xf]  ;;  %v1704_v54 = vld [vmem:[%s2981_s0 + $0x198] sm:$0xf0]  ;;  %v1566_v55 = vld [vmem:[%s2981_s0 + $0x80] sm:$0xf] }
  0x18   :  { %v1547_v16 = vor.u32 %v1846_v12, %v1544_v13  ;;  %v1886_v53 = vld [vmem:[%s2981_s0 + $0x194] sm:$0xf]  ;;  %v1694_v58 = vld [vmem:[%s2981_s0 + $0x180] sm:$0xf]  ;;  %v1885_v59 = vld [vmem:[%s2981_s0 + $0x184] sm:$0xf0] }
  0x19   :  { %v1695_v0 = vor.u32 %v1885_v59, %v1694_v58  ;;  %v1574_v12 = vld [vmem:[%s2981_s0 + $0x90] sm:$0xf]  ;;  %v1888_v13 = vld [vmem:[%s2981_s0 + $0x1a4] sm:$0xf]  ;;  %v1855_v15 = vld [vmem:[%s2981_s0 + $0x94] sm:$0xf0] }
  0x1a   :  { %1804 = vmatmul.msk.bf16.vlgmr.msra.gmra.mxu1 %vm600_vm1, %v1507_v18  ;;  %707 = vmatpush.bf16.msra.mxu0 %v1901_v19  ;;  %v1542_v18 = vld [vmem:[%s2981_s0 + $0x50] sm:$0xf]  ;;  %v1584_v30 = vld [vmem:[%s2981_s0 + $0xa8] sm:$0xf0] }
  0x1b   :  { %1821 = vmatmul.msk.bf16.vlgmr.msra.gmra.mxu3 %vm600_vm1, %v1643_v20  ;;  %1918 = vmatpush.bf16.msra.mxu2 %v1901_v19  ;;  %v1847_v19 = vld [vmem:[%s2981_s0 + $0x54] sm:$0xf0]  ;;  %v1670_v20 = vld [vmem:[%s2981_s0 + $0x150] sm:$0xf] }
  0x1c   :  { %v1543_v22 = vor.u32 %v1847_v19, %v1542_v18  ;;  %v1702_v18 = vld [vmem:[%s2981_s0 + $0x190] sm:$0xf]  ;;  %v1887_v19 = vld [vmem:[%s2981_s0 + $0x194] sm:$0xf0] }
  0x1e   :  { %708 = vmatpush.bf16.msra.mxu0 %v1900_v21 }
  0x1f   :  { %1919 = vmatpush.bf16.msra.mxu2 %v1900_v21  ;;  %v1879_v21 = vld [vmem:[%s2981_s0 + $0x154] sm:$0xf0] }
  0x20   :  { %v1671_v23 = vor.u32 %v1879_v21, %v1670_v20 }
  0x21   :  { %709 = vmatmul.bf16.vlgmr.msra.gmra.mxu0 %v1503_v26  ;;  %v1882_v26 = vld [vmem:[%s2981_s0 + $0x174] sm:$0xf] }
  0x22   :  { %789 = vmatmul.bf16.vlgmr.msra.gmra.mxu2 %v1631_v27  ;;  %v1688_v27 = vld [vmem:[%s2981_s0 + $0x178] sm:$0xf0] }
  0x23   :  { %v1691_v29 = vor.u32 %v1882_v26, %v1688_v27  ;;  %v1703_v26 = vor.u32 %v1887_v19, %v1702_v18 }
  0x2a   :  { %1805 = vmatmul.msk.bf16.gmra.mxu1 %vm600_vm1, %v1515_v32  ;;  %v1928_v32 = vmov 0.0  }
  0x2b   :  { %1822 = vmatmul.msk.bf16.gmra.mxu3 %vm600_vm1, %v1651_v33  ;;  %20 = vst.msk [vmem:[#allocation2] sm:$0xff] %vm19_vm2, %v1928_v32  ;;  %v1678_v33 = vld [vmem:[%s2981_s0 + $0x160] sm:$0xf] }
  0x2c   :  { %21 = vst.msk [vmem:[#allocation2 + $0x8] sm:$0xff] %vm19_vm2, %v1928_v32  ;;  %v1679_v36 = vor.u32 %v1881_v34, %v1678_v33 }
  0x2d   :  { %22 = vst.msk [vmem:[#allocation2 + $0x10] sm:$0xff] %vm19_vm2, %v1928_v32 }
  0x2e   :  { %23 = vst.msk [vmem:[#allocation2 + $0x18] sm:$0xff] %vm19_vm2, %v1928_v32 }
  0x2f   :  { %24 = vst.msk [vmem:[#allocation2 + $0x20] sm:$0xff] %vm19_vm2, %v1928_v32 }
  0x30   :  { %25 = vst.msk [vmem:[#allocation2 + $0x28] sm:$0xff] %vm19_vm2, %v1928_v32 }
  0x31   :  { %714 = vmatmul.bf16.gmra.mxu0 %v1511_v38  ;;  %26 = vst.msk [vmem:[#allocation2 + $0x30] sm:$0xff] %vm19_vm2, %v1928_v32  ;;  %v1560_v38 = vld [vmem:[%s2981_s0 + $0x78] sm:$0xf0] }
  0x32   :  { %794 = vmatmul.bf16.gmra.mxu2 %v1639_v39  ;;  %27 = vst.msk [vmem:[#allocation2 + $0x38] sm:$0xff] %vm19_vm2, %v1928_v32  ;;  %v1884_v39 = vld [vmem:[%s2981_s0 + $0x184] sm:$0xf]  ;;  %v1563_v41 = vor.u32 %v1850_v37, %v1560_v38 }
  0x33   :  { %28 = vst.msk [vmem:[#allocation2 + $0x40] sm:$0xff] %vm19_vm2, %v1928_v32  ;;  %v1699_v42 = vor.u32 %v1884_v39, %v1696_v40  ;;  %v85_v33 = vld [vmem:[#allocation2 + $0x8] sm:$0xff] }
  0x34   :  { %29 = vst.msk [vmem:[#allocation2 + $0x48] sm:$0xff] %vm19_vm2, %v1928_v32  ;;  %v86_v37 = vld [vmem:[#allocation2 + $0x10] sm:$0xff] }
  0x35   :  { %30 = vst.msk [vmem:[#allocation2 + $0x50] sm:$0xff] %vm19_vm2, %v1928_v32 }
  0x36   :  { %31 = vst.msk [vmem:[#allocation2 + $0x58] sm:$0xff] %vm19_vm2, %v1928_v32 }
  0x37   :  { %32 = vst.msk [vmem:[#allocation2 + $0x60] sm:$0xff] %vm19_vm2, %v1928_v32 }
  0x38   :  { %33 = vst.msk [vmem:[#allocation2 + $0x68] sm:$0xff] %vm19_vm2, %v1928_v32 }
  0x39   :  { %34 = vst.msk [vmem:[#allocation2 + $0x70] sm:$0xff] %vm19_vm2, %v1928_v32 }
  0x3a   :  { %1806 = vmatmul.msk.bf16.gmra.mxu1 %vm600_vm1, %v1523_v44  ;;  %35 = vst.msk [vmem:[#allocation2 + $0x78] sm:$0xff] %vm19_vm2, %v1928_v32  ;;  %v1851_v44 = vld [vmem:[%s2981_s0 + $0x74] sm:$0xf0] }
  0x3b   :  { %1823 = vmatmul.msk.bf16.gmra.mxu3 %vm600_vm1, %v1659_v45  ;;  %36 = vst.msk [vmem:[#allocation2 + $0x80] sm:$0xff] %vm19_vm2, %v1928_v32  ;;  %v1686_v45 = vld [vmem:[%s2981_s0 + $0x170] sm:$0xf]  ;;  %v1559_v47 = vor.u32 %v1851_v44, %v1558_v43 }
  0x3c   :  { %37 = vst.msk [vmem:[#allocation2 + $0x88] sm:$0xff] %vm19_vm2, %v1928_v32  ;;  %v1687_v48 = vor.u32 %v1883_v46, %v1686_v45  ;;  %v87_v45 = vld [vmem:[#allocation2 + $0x18] sm:$0xff] }
  0x3d   :  { %38 = vst.msk [vmem:[#allocation2 + $0x90] sm:$0xff] %vm19_vm2, %v1928_v32 }
  0x3e   :  { %39 = vst.msk [vmem:[#allocation2 + $0x98] sm:$0xff] %vm19_vm2, %v1928_v32 }
  0x3f   :  { %40 = vst.msk [vmem:[#allocation2 + $0xa0] sm:$0xff] %vm19_vm2, %v1928_v32 }
  0x40   :  { %41 = vst.msk [vmem:[#allocation2 + $0xa8] sm:$0xff] %vm19_vm2, %v1928_v32 }
  0x41   :  { %719 = vmatmul.bf16.gmra.mxu0 %v1519_v50  ;;  %42 = vst.msk [vmem:[#allocation2 + $0xb0] sm:$0xff] %vm19_vm2, %v1928_v32  ;;  %v1568_v50 = vld [vmem:[%s2981_s0 + $0x88] sm:$0xf0] }
  0x42   :  { %799 = vmatmul.bf16.gmra.mxu2 %v1647_v51  ;;  %43 = vst.msk [vmem:[#allocation2 + $0xb8] sm:$0xff] %vm19_vm2, %v1928_v32  ;;  %v1571_v51 = vor.u32 %v1852_v49, %v1568_v50  ;;  %v1582_v50 = vld [vmem:[%s2981_s0 + $0xa0] sm:$0xf] }
  0x43   :  { %44 = vst.msk [vmem:[#allocation2 + $0xc0] sm:$0xff] %vm19_vm2, %v1928_v32 }
  0x44   :  { %45 = vst.msk [vmem:[#allocation2 + $0xc8] sm:$0xff] %vm19_vm2, %v1928_v32 }
  0x45   :  { %46 = vst.msk [vmem:[#allocation2 + $0xd0] sm:$0xff] %vm19_vm2, %v1928_v32 }
  0x46   :  { %47 = vst.msk [vmem:[#allocation2 + $0xd8] sm:$0xff] %vm19_vm2, %v1928_v32 }
  0x47   :  { %48 = vst.msk [vmem:[#allocation2 + $0xe0] sm:$0xff] %vm19_vm2, %v1928_v32 }
  0x48   :  { %49 = vst.msk [vmem:[#allocation2 + $0xe8] sm:$0xff] %vm19_vm2, %v1928_v32 }
  0x49   :  { %50 = vst.msk [vmem:[#allocation2 + $0xf0] sm:$0xff] %vm19_vm2, %v1928_v32 }
  0x4a   :  { %1807 = vmatmul.msk.bf16.gmra.mxu1 %vm600_vm1, %v1531_v56  ;;  %51 = vst.msk [vmem:[#allocation2 + $0xf8] sm:$0xff] %vm19_vm2, %v1928_v32  ;;  %v1853_v56 = vld [vmem:[%s2981_s0 + $0x84] sm:$0xf0] }
  0x4b   :  { %1824 = vmatmul.msk.bf16.gmra.mxu3 %vm600_vm1, %v1667_v57  ;;  %52 = vst.msk [vmem:[#allocation2 + $0x100] sm:$0xff] %vm19_vm2, %v1928_v32  ;;  %v1707_v57 = vor.u32 %v1886_v53, %v1704_v54  ;;  %v1567_v60 = vor.u32 %v1853_v56, %v1566_v55  ;;  %v1710_v54 = vld [vmem:[%s2981_s0 + $0x1a0] sm:$0xf]  ;;  %v1889_v55 = vld [vmem:[%s2981_s0 + $0x1a4] sm:$0xf0] }
  0x4c   :  { %53 = vst.msk [vmem:[#allocation2 + $0x108] sm:$0xff] %vm19_vm2, %v1928_v32 }
  0x4d   :  { %54 = vst.msk [vmem:[#allocation2 + $0x110] sm:$0xff] %vm19_vm2, %v1928_v32 }
  0x4e   :  { %55 = vst.msk [vmem:[#allocation2 + $0x118] sm:$0xff] %vm19_vm2, %v1928_v32 }
  0x4f   :  { %56 = vst.msk [vmem:[#allocation2 + $0x120] sm:$0xff] %vm19_vm2, %v1928_v32 }
  0x50   :  { %57 = vst.msk [vmem:[#allocation2 + $0x128] sm:$0xff] %vm19_vm2, %v1928_v32 }
  0x51   :  { %724 = vmatmul.bf16.gmra.mxu0 %v1527_v62  ;;  %v84_v62 = vld [vmem:[#allocation2] sm:$0xff]  ;;  %58 = vst.msk [vmem:[#allocation2 + $0x130] sm:$0xff] %vm19_vm2, %v1928_v32 }
  0x52   :  { %804 = vmatmul.bf16.gmra.mxu2 %v1655_v63  ;;  %59 = vst.msk [vmem:[#allocation2 + $0x138] sm:$0xff] %vm19_vm2, %v1928_v32 }
  0x53   :  { %60 = vst.msk [vmem:[#allocation2 + $0x140] sm:$0xff] %vm19_vm2, %v1928_v32 }
  0x54   :  { %61 = vst.msk [vmem:[#allocation2 + $0x148] sm:$0xff] %vm19_vm2, %v1928_v32 }
  0x55   :  { %62 = vst.msk [vmem:[#allocation2 + $0x150] sm:$0xff] %vm19_vm2, %v1928_v32  ;;  %v119_v56 = vld [vmem:[#allocation2 + $0x118] sm:$0xff] }
  0x56   :  { %63 = vst.msk [vmem:[#allocation2 + $0x158] sm:$0xff] %vm19_vm2, %v1928_v32 }
  0x57   :  { %64 = vst.msk [vmem:[#allocation2 + $0x160] sm:$0xff] %vm19_vm2, %v1928_v32 }
  0x58   :  { %65 = vst.msk [vmem:[#allocation2 + $0x168] sm:$0xff] %vm19_vm2, %v1928_v32 }
  0x59   :  { %66 = vst.msk [vmem:[#allocation2 + $0x170] sm:$0xff] %vm19_vm2, %v1928_v32 }
  0x5a   :  { %1808 = vmatmul.msk.bf16.gmra.mxu1 %vm600_vm1, %v1539_v4  ;;  %v1854_v4 = vld [vmem:[%s2981_s0 + $0x94] sm:$0xf]  ;;  %67 = vst.msk [vmem:[#allocation2 + $0x178] sm:$0xff] %vm19_vm2, %v1928_v32 }
  0x5b   :  { %1825 = vmatmul.msk.bf16.gmra.mxu3 %vm600_vm1, %v1675_v5  ;;  %v1576_v5 = vld [vmem:[%s2981_s0 + $0x98] sm:$0xf0]  ;;  %68 = vst.msk [vmem:[#allocation2 + $0x180] sm:$0xff] %vm19_vm2, %v1928_v32 }
  0x5c   :  { %v1579_v7 = vor.u32 %v1854_v4, %v1576_v5  ;;  %69 = vst.msk [vmem:[#allocation2 + $0x188] sm:$0xff] %vm19_vm2, %v1928_v32  ;;  %v1592_v4 = vld [vmem:[%s2981_s0 + $0xb8] sm:$0xf0] }
  0x5d   :  { %70 = vst.msk [vmem:[#allocation2 + $0x190] sm:$0xff] %vm19_vm2, %v1928_v32 }
  0x5e   :  { %71 = vst.msk [vmem:[#allocation2 + $0x198] sm:$0xff] %vm19_vm2, %v1928_v32 }
  0x5f   :  { %72 = vst.msk [vmem:[#allocation2 + $0x1a0] sm:$0xff] %vm19_vm2, %v1928_v32 }
  0x60   :  { %73 = vst.msk [vmem:[#allocation2 + $0x1a8] sm:$0xff] %vm19_vm2, %v1928_v32 }
  0x61   :  { %729 = vmatmul.bf16.gmra.mxu0 %v1535_v10  ;;  %v2326_v10 = vld [vmem:[%s2982_s2] ss:$0 sm:$0xff]  ;;  %74 = vst.msk [vmem:[#allocation2 + $0x1b0] sm:$0xff] %vm19_vm2, %v1928_v32 }
  0x62   :  { %809 = vmatmul.bf16.gmra.mxu2 %v1663_v11  ;;  %75 = vst.msk [vmem:[#allocation2 + $0x1b8] sm:$0xff] %vm19_vm2, %v1928_v32 }
  0x63   :  { %76 = vst.msk [vmem:[#allocation2 + $0x1c0] sm:$0xff] %vm19_vm2, %v1928_v32 }
  0x64   :  { %77 = vst.msk [vmem:[#allocation2 + $0x1c8] sm:$0xff] %vm19_vm2, %v1928_v32 }
  0x65   :  { %78 = vst.msk [vmem:[#allocation2 + $0x1d0] sm:$0xff] %vm19_vm2, %v1928_v32 }
  0x66   :  { %79 = vst.msk [vmem:[#allocation2 + $0x1d8] sm:$0xff] %vm19_vm2, %v1928_v32 }
  0x67   :  { %80 = vst.msk [vmem:[#allocation2 + $0x1e0] sm:$0xff] %vm19_vm2, %v1928_v32 }
  0x68   :  { %81 = vst.msk [vmem:[#allocation2 + $0x1e8] sm:$0xff] %vm19_vm2, %v1928_v32 }
  0x69   :  { %82 = vst.msk [vmem:[#allocation2 + $0x1f0] sm:$0xff] %vm19_vm2, %v1928_v32 }
  0x6a   :  { %1809 = vmatmul.msk.bf16.gmra.mxu1 %vm600_vm1, %v1547_v16  ;;  %v1712_v16 = vld [vmem:[%s2981_s0 + $0x1a8] sm:$0xf0]  ;;  %83 = vst.msk [vmem:[#allocation2 + $0x1f8] sm:$0xff] %vm19_vm2, %v1928_v32 }
  0x6b   :  { %1826 = vmatmul.msk.bf16.gmra.mxu3 %vm600_vm1, %v1683_v17  ;;  %v1715_v20 = vor.u32 %v1888_v13, %v1712_v16 }
  0x71   :  { %734 = vmatmul.bf16.gmra.mxu0 %v1543_v22 }
  0x72   :  { %814 = vmatmul.bf16.gmra.mxu2 %v1671_v23  ;;  %v1575_v23 = vor.u32 %v1855_v15, %v1574_v12 }
  0x7a   :  { %1810 = vmatmul.msk.bf16.gmra.mxu1 %vm600_vm1, %v1555_v28 }
  0x7b   :  { %1827 = vmatmul.msk.bf16.gmra.mxu3 %vm600_vm1, %v1691_v29  ;;  %v1856_v29 = vld [vmem:[%s2981_s0 + $0xa4] sm:$0xf] }
  0x81   :  { %739 = vmatmul.bf16.gmra.mxu0 %v1551_v35 }
  0x82   :  { %819 = vmatmul.bf16.gmra.mxu2 %v1679_v36  ;;  %v1587_v36 = vor.u32 %v1856_v29, %v1584_v30  ;;  %v89_v29 = vld [vmem:[#allocation2 + $0x28] sm:$0xff]  ;;  %v1590_v30 = vld [vmem:[%s2981_s0 + $0xb0] sm:$0xf] }
  0x8a   :  { %1811 = vmatmul.msk.bf16.gmra.mxu1 %vm600_vm1, %v1563_v41  ;;  %v118_v41 = vld [vmem:[#allocation2 + $0x110] sm:$0xff] }
  0x8b   :  { %1828 = vmatmul.msk.bf16.gmra.mxu3 %vm600_vm1, %v1699_v42 }
  0x91   :  { %744 = vmatmul.bf16.gmra.mxu0 %v1559_v47  ;;  %v1890_v47 = vld [vmem:[%s2981_s0 + $0x1b4] sm:$0xf] }
  0x92   :  { %824 = vmatmul.bf16.gmra.mxu2 %v1687_v48  ;;  %v1720_v48 = vld [vmem:[%s2981_s0 + $0x1b8] sm:$0xf0] }
  0x97   :  { %v879_v52 = vpop.f32.mrf.mxu1 }
  0x9a   :  { %1812 = vmatmul.msk.bf16.gmra.mxu1 %vm600_vm1, %v1571_v51  ;;  %v1857_v51 = vld [vmem:[%s2981_s0 + $0xa4] sm:$0xf0] }
  0x9b   :  { %1829 = vmatmul.msk.bf16.gmra.mxu3 %vm600_vm1, %v1707_v57  ;;  %v1583_v58 = vor.u32 %v1857_v51, %v1582_v50  ;;  %v121_v50 = vld [vmem:[#allocation2 + $0x128] sm:$0xff] }
  0x9e   :  { %v710_v63 = vpop.f32.mrf.mxu0  ;;  %v2300_v2 = vpop.f32.mrf.mxu3 }
  0x9f   :  { %v2294_v61 = vpop.f32.mrf.mxu1  ;;  %v880_v1 = vadd.f32 %v879_v52, %v710_v63  ;;  %v1723_v52 = vor.u32 %v1890_v47, %v1720_v48  ;;  %v1891_v47 = vld [vmem:[%s2981_s0 + $0x1b4] sm:$0xf0] }
  0xa1   :  { %v1039_v3 = vadd.f32 %v880_v1, %v84_v62  ;;  %749 = vmatmul.bf16.gmra.mxu0 %v1567_v60  ;;  %v88_v60 = vld [vmem:[#allocation2 + $0x20] sm:$0xff]  ;;  %v1711_v62 = vor.u32 %v1889_v55, %v1710_v54 }
  0xa2   :  { %829 = vmatmul.bf16.gmra.mxu2 %v1695_v0 }
  0xa3   :  { %1104 = vst.msk [vmem:[#allocation2] sm:$0xff] %vm19_vm2, %v1039_v3  ;;  %v1858_v3 = vld [vmem:[%s2981_s0 + $0xb4] sm:$0xf] }
  0xa4   :  { %v1595_v13 = vor.u32 %v1858_v3, %v1592_v4 }
  0xa5   :  { %v2319_v6 = vpop.f32.mrf.mxu2 }
  0xa6   :  { %v712_v9 = vpop.f32.mrf.mxu0  ;;  %v2330_v11 = vpop.f32.mrf.mxu3 }
  0xa7   :  { %v884_v8 = vpop.f32.mrf.mxu1  ;;  %v882_v31 = vadd.f32 %v2294_v61, %v712_v9 }
  0xa9   :  { %v1040_v44 = vadd.f32 %v882_v31, %v85_v33 }
  0xaa   :  { %1813 = vmatmul.msk.bf16.gmra.mxu1 %vm600_vm1, %v1579_v7  ;;  %v1171_v14 = vld [vmem:[#allocation2] sm:$0xff] }
  0xab   :  { %v1239_v17 = vadd.f32 %v2326_v10, %v1171_v14  ;;  %1830 = vmatmul.msk.bf16.gmra.mxu3 %vm600_vm1, %v1715_v20  ;;  %1105 = vst.msk [vmem:[#allocation2 + $0x8] sm:$0xff] %vm19_vm2, %v1040_v44 }
  0xad   :  { %v1303_v21 = vmax.f32 %v1239_v17, 0.0  ;;  %v2364_v22 = vpop.f32.mrf.mxu2 }
  0xae   :  { %v715_v25 = vpop.f32.mrf.mxu0  ;;  %v2371_v28 = vpop.f32.mrf.mxu3 }
  0xaf   :  { %v886_v24 = vpop.f32.mrf.mxu1  ;;  %v1367_v27 = vpack.c.bf16 %v1303_v21, %v1303_v21  ;;  %v885_v34 = vadd.f32 %v884_v8, %v715_v25 }
  0xb1   :  { %1432 = vst.msk [vmem:[%s2983_s3] sm:$0xf] %vm1431_vm3, %v1367_v27  ;;  %754 = vmatmul.bf16.gmra.mxu0 %v1575_v23  ;;  %v1041_v46 = vadd.f32 %v885_v34, %v86_v37  ;;  %v120_v23 = vld [vmem:[#allocation2 + $0x120] sm:$0xff] }
  0xb2   :  { %834 = vmatmul.bf16.gmra.mxu2 %v1703_v26  ;;  %v1172_v5 = vld [vmem:[#allocation2 + $0x8] sm:$0xff] }
  0xb3   :  { %1106 = vst.msk [vmem:[#allocation2 + $0x10] sm:$0xff] %vm19_vm2, %v1041_v46  ;;  %v1240_v7 = vadd.f32 %v2326_v10, %v1172_v5  ;;  %v1718_v46 = vld [vmem:[%s2981_s0 + $0x1b0] sm:$0xf] }
  0xb5   :  { %v795_v35 = vpop.f32.mrf.mxu2  ;;  %v1304_v14 = vmax.f32 %v1240_v7, 0.0 }
  0xb6   :  { %v965_v38 = vadd.f32 %v2300_v2, %v795_v35  ;;  %v717_v40 = vpop.f32.mrf.mxu0  ;;  %v2399_v43 = vpop.f32.mrf.mxu3  ;;  %v1728_v35 = vld [vmem:[%s2981_s0 + $0x1c8] sm:$0xf0] }
  0xb7   :  { %v889_v39 = vpop.f32.mrf.mxu1  ;;  %v887_v42 = vadd.f32 %v886_v24, %v717_v40  ;;  %v1368_v26 = vpack.c.bf16 %v1304_v14, %v1304_v14  ;;  %v1859_v40 = vld [vmem:[%s2981_s0 + $0xb4] sm:$0xf0] }
  0xb8   :  { %v1073_v49 = vadd.f32 %v965_v38, %v118_v41 }
  0xb9   :  { %v1042_v53 = vadd.f32 %v887_v42, %v87_v45  ;;  %1433 = vst.msk [vmem:[%s2983_s3 + $0x4] sm:$0xf] %vm1431_vm3, %v1368_v26 }
  0xba   :  { %1814 = vmatmul.msk.bf16.gmra.mxu1 %vm600_vm1, %v1587_v36  ;;  %1138 = vst.msk [vmem:[#allocation2 + $0x110] sm:$0xff] %vm19_vm2, %v1073_v49  ;;  %v1173_v8 = vld [vmem:[#allocation2 + $0x10] sm:$0xff] }
  0xbb   :  { %1831 = vmatmul.msk.bf16.gmra.mxu3 %vm600_vm1, %v1723_v52  ;;  %1107 = vst.msk [vmem:[#allocation2 + $0x18] sm:$0xff] %vm19_vm2, %v1042_v53  ;;  %v1241_v9 = vadd.f32 %v2326_v10, %v1173_v8  ;;  %v1591_v52 = vor.u32 %v1859_v40, %v1590_v30 }
  0xbd   :  { %v797_v57 = vpop.f32.mrf.mxu2  ;;  %v1305_v20 = vmax.f32 %v1241_v9, 0.0 }
  0xbe   :  { %v967_v32 = vadd.f32 %v2330_v11, %v797_v57  ;;  %v720_v61 = vpop.f32.mrf.mxu0  ;;  %v2434_v0 = vpop.f32.mrf.mxu3 }
  0xbf   :  { %v891_v59 = vpop.f32.mrf.mxu1  ;;  %v890_v63 = vadd.f32 %v889_v39, %v720_v61  ;;  %v1369_v31 = vpack.c.bf16 %v1305_v20, %v1305_v20 }
  0xc0   :  { %v1074_v1 = vadd.f32 %v967_v32, %v119_v56  ;;  %v90_v56 = vld [vmem:[#allocation2 + $0x30] sm:$0xff] }
  0xc1   :  { %v1043_v2 = vadd.f32 %v890_v63, %v88_v60  ;;  %759 = vmatmul.bf16.gmra.mxu0 %v1583_v58  ;;  %v1205_v11 = vld [vmem:[#allocation2 + $0x110] sm:$0xff]  ;;  %1434 = vst.msk [vmem:[%s2983_s3 + $0x8] sm:$0xf] %vm1431_vm3, %v1369_v31  ;;  %v1719_v58 = vor.u32 %v1891_v47, %v1718_v46  ;;  %v1600_v63 = vld [vmem:[%s2981_s0 + $0xc8] sm:$0xf0] }
  0xc2   :  { %1139 = vst.msk [vmem:[#allocation2 + $0x118] sm:$0xff] %vm19_vm2, %v1074_v1  ;;  %839 = vmatmul.bf16.gmra.mxu2 %v1711_v62  ;;  %v1273_v15 = vadd.f32 %v2326_v10, %v1205_v11  ;;  %v1174_v16 = vld [vmem:[#allocation2 + $0x18] sm:$0xff]  ;;  %v1860_v62 = vld [vmem:[%s2981_s0 + $0xc4] sm:$0xf] }
  0xc3   :  { %1108 = vst.msk [vmem:[#allocation2 + $0x20] sm:$0xff] %vm19_vm2, %v1043_v2  ;;  %v1242_v21 = vadd.f32 %v2326_v10, %v1174_v16  ;;  %v122_v2 = vld [vmem:[#allocation2 + $0x130] sm:$0xff]  ;;  %v1603_v4 = vor.u32 %v1860_v62, %v1600_v63  ;;  %v91_v11 = vld [vmem:[#allocation2 + $0x38] sm:$0xff] }
  0xc4   :  { %v1337_v27 = vmax.f32 %v1273_v15, 0.0 }
  0xc5   :  { %v800_v12 = vpop.f32.mrf.mxu2  ;;  %v1306_v33 = vmax.f32 %v1242_v21, 0.0  ;;  %v1894_v21 = vld [vmem:[%s2981_s0 + $0x1d4] sm:$0xf] }
  0xc6   :  { %v970_v17 = vadd.f32 %v2371_v28, %v800_v12  ;;  %v722_v19 = vpop.f32.mrf.mxu0  ;;  %v2449_v25 = vpop.f32.mrf.mxu3  ;;  %v1892_v28 = vld [vmem:[%s2981_s0 + $0x1c4] sm:$0xf]  ;;  %v1401_v36 = vpack.c.bf16 %v1337_v27, %v1337_v27  ;;  %v1598_v27 = vld [vmem:[%s2981_s0 + $0xc0] sm:$0xf] }
  0xc7   :  { %v894_v18 = vpop.f32.mrf.mxu1  ;;  %v892_v24 = vadd.f32 %v891_v59, %v722_v19  ;;  %v1731_v41 = vor.u32 %v1892_v28, %v1728_v35  ;;  %v1370_v42 = vpack.c.bf16 %v1306_v33, %v1306_v33  ;;  %v1893_v28 = vld [vmem:[%s2981_s0 + $0x1c4] sm:$0xf0] }
  0xc8   :  { %v1075_v39 = vadd.f32 %v970_v17, %v120_v23  ;;  %1466 = vst.msk [vmem:[%s2983_s3 + $0x88] sm:$0xf] %vm1431_vm3, %v1401_v36 }
  0xc9   :  { %v1206_v34 = vld [vmem:[#allocation2 + $0x118] sm:$0xff]  ;;  %v1044_v45 = vadd.f32 %v892_v24, %v89_v29  ;;  %1435 = vst.msk [vmem:[%s2983_s3 + $0xc] sm:$0xf] %vm1431_vm3, %v1370_v42  ;;  %v1861_v29 = vld [vmem:[%s2981_s0 + $0xc4] sm:$0xf0] }
  0xca   :  { %1815 = vmatmul.msk.bf16.gmra.mxu1 %vm600_vm1, %v1595_v13  ;;  %v1274_v37 = vadd.f32 %v2326_v10, %v1206_v34  ;;  %v1175_v38 = vld [vmem:[#allocation2 + $0x20] sm:$0xff]  ;;  %1140 = vst.msk [vmem:[#allocation2 + $0x120] sm:$0xff] %vm19_vm2, %v1075_v39  ;;  %v1599_v39 = vor.u32 %v1861_v29, %v1598_v27 }
  0xcb   :  { %v1243_v44 = vadd.f32 %v2326_v10, %v1175_v38  ;;  %1832 = vmatmul.msk.bf16.gmra.mxu3 %vm600_vm1, %v1731_v41  ;;  %1109 = vst.msk [vmem:[#allocation2 + $0x28] sm:$0xff] %vm19_vm2, %v1044_v45  ;;  %v1726_v34 = vld [vmem:[%s2981_s0 + $0x1c0] sm:$0xf] }
  0xcc   :  { %v1338_v48 = vmax.f32 %v1274_v37, 0.0  ;;  %v123_v37 = vld [vmem:[#allocation2 + $0x138] sm:$0xff]  ;;  %v1727_v46 = vor.u32 %v1893_v28, %v1726_v34 }
  0xcd   :  { %v1307_v49 = vmax.f32 %v1243_v44, 0.0  ;;  %v802_v51 = vpop.f32.mrf.mxu2  ;;  %v92_v44 = vld [vmem:[#allocation2 + $0x40] sm:$0xff] }
  0xce   :  { %v1402_v53 = vpack.c.bf16 %v1338_v48, %v1338_v48  ;;  %v972_v54 = vadd.f32 %v2399_v43, %v802_v51  ;;  %v725_v57 = vpop.f32.mrf.mxu0  ;;  %v2492_v60 = vpop.f32.mrf.mxu3 }
  0xcf   :  { %v896_v55 = vpop.f32.mrf.mxu1  ;;  %v1371_v32 = vpack.c.bf16 %v1307_v49, %v1307_v49  ;;  %v895_v59 = vadd.f32 %v894_v18, %v725_v57 }
  0xd0   :  { %1467 = vst.msk [vmem:[%s2983_s3 + $0x8c] sm:$0xf] %vm1431_vm3, %v1402_v53  ;;  %v1076_v61 = vadd.f32 %v972_v54, %v121_v50  ;;  %v1862_v54 = vld [vmem:[%s2981_s0 + $0xd4] sm:$0xf] }
  0xd1   :  { %1436 = vst.msk [vmem:[%s2983_s3 + $0x10] sm:$0xf] %vm1431_vm3, %v1371_v32  ;;  %v1045_v43 = vadd.f32 %v895_v59, %v90_v56  ;;  %764 = vmatmul.bf16.gmra.mxu0 %v1591_v52  ;;  %v1207_v1 = vld [vmem:[#allocation2 + $0x120] sm:$0xff] }
  0xd2   :  { %1141 = vst.msk [vmem:[#allocation2 + $0x128] sm:$0xff] %vm19_vm2, %v1076_v61  ;;  %844 = vmatmul.bf16.gmra.mxu2 %v1719_v58  ;;  %v1275_v5 = vadd.f32 %v2326_v10, %v1207_v1  ;;  %v1176_v7 = vld [vmem:[#allocation2 + $0x28] sm:$0xff]  ;;  %v124_v32 = vld [vmem:[#allocation2 + $0x140] sm:$0xff] }
  0xd3   :  { %1110 = vst.msk [vmem:[#allocation2 + $0x30] sm:$0xff] %vm19_vm2, %v1045_v43  ;;  %v1244_v13 = vadd.f32 %v2326_v10, %v1176_v7  ;;  %v93_v1 = vld [vmem:[#allocation2 + $0x48] sm:$0xff] }
  0xd4   :  { %v1339_v16 = vmax.f32 %v1275_v5, 0.0 }
  0xd5   :  { %v805_v3 = vpop.f32.mrf.mxu2  ;;  %v1308_v18 = vmax.f32 %v1244_v13, 0.0 }
  0xd6   :  { %v975_v8 = vadd.f32 %v2434_v0, %v805_v3  ;;  %v727_v12 = vpop.f32.mrf.mxu0  ;;  %v2513_v15 = vpop.f32.mrf.mxu3  ;;  %v1736_v0 = vld [vmem:[%s2981_s0 + $0x1d8] sm:$0xf0]  ;;  %v1403_v23 = vpack.c.bf16 %v1339_v16, %v1339_v16  ;;  %v1744_v16 = vld [vmem:[%s2981_s0 + $0x1e8] sm:$0xf0] }
  0xd7   :  { %v899_v9 = vpop.f32.mrf.mxu1  ;;  %v897_v14 = vadd.f32 %v896_v55, %v727_v12  ;;  %v1739_v30 = vor.u32 %v1894_v21, %v1736_v0  ;;  %v1372_v31 = vpack.c.bf16 %v1308_v18, %v1308_v18  ;;  %v1608_v55 = vld [vmem:[%s2981_s0 + $0xd8] sm:$0xf0]  ;;  %v1734_v18 = vld [vmem:[%s2981_s0 + $0x1d0] sm:$0xf] }
  0xd8   :  { %v1077_v17 = vadd.f32 %v975_v8, %v122_v2  ;;  %1468 = vst.msk [vmem:[%s2983_s3 + $0x90] sm:$0xf] %vm1431_vm3, %v1403_v23  ;;  %v1611_v61 = vor.u32 %v1862_v54, %v1608_v55  ;;  %v1606_v8 = vld [vmem:[%s2981_s0 + $0xd0] sm:$0xf]  ;;  %v125_v23 = vld [vmem:[#allocation2 + $0x148] sm:$0xff] }
  0xd9   :  { %v1208_v19 = vld [vmem:[#allocation2 + $0x128] sm:$0xff]  ;;  %v1046_v20 = vadd.f32 %v897_v14, %v91_v11  ;;  %1437 = vst.msk [vmem:[%s2983_s3 + $0x14] sm:$0xf] %vm1431_vm3, %v1372_v31  ;;  %v1896_v11 = vld [vmem:[%s2981_s0 + $0x1e4] sm:$0xf]  ;;  %v94_v31 = vld [vmem:[#allocation2 + $0x50] sm:$0xff] }
  0xda   :  { %1816 = vmatmul.msk.bf16.gmra.mxu1 %vm600_vm1, %v1603_v4  ;;  %v1276_v24 = vadd.f32 %v2326_v10, %v1208_v19  ;;  %v1177_v26 = vld [vmem:[#allocation2 + $0x30] sm:$0xff]  ;;  %1142 = vst.msk [vmem:[#allocation2 + $0x130] sm:$0xff] %vm19_vm2, %v1077_v17  ;;  %v1863_v14 = vld [vmem:[%s2981_s0 + $0xd4] sm:$0xf0] }
  0xdb   :  { %v1245_v33 = vadd.f32 %v2326_v10, %v1177_v26  ;;  %1111 = vst.msk [vmem:[#allocation2 + $0x38] sm:$0xff] %vm19_vm2, %v1046_v20  ;;  %1833 = vmatmul.msk.bf16.gmra.mxu3 %vm600_vm1, %v1739_v30  ;;  %v1895_v19 = vld [vmem:[%s2981_s0 + $0x1d4] sm:$0xf0]  ;;  %v1747_v20 = vor.u32 %v1896_v11, %v1744_v16  ;;  %v1607_v26 = vor.u32 %v1863_v14, %v1606_v8 }
  0xdc   :  { %v1340_v35 = vmax.f32 %v1276_v24, 0.0  ;;  %v1735_v34 = vor.u32 %v1895_v19, %v1734_v18 }
  0xdd   :  { %v1309_v36 = vmax.f32 %v1245_v33, 0.0  ;;  %v807_v38 = vpop.f32.mrf.mxu2 }
  0xde   :  { %v1404_v40 = vpack.c.bf16 %v1340_v35, %v1340_v35  ;;  %v977_v41 = vadd.f32 %v2449_v25, %v807_v38  ;;  %v730_v45 = vpop.f32.mrf.mxu0  ;;  %v2548_v49 = vpop.f32.mrf.mxu3 }
  0xdf   :  { %v901_v42 = vpop.f32.mrf.mxu1  ;;  %v1373_v47 = vpack.c.bf16 %v1309_v36, %v1309_v36  ;;  %v900_v48 = vadd.f32 %v899_v9, %v730_v45 }
  0xe0   :  { %1469 = vst.msk [vmem:[%s2983_s3 + $0x94] sm:$0xf] %vm1431_vm3, %v1404_v40  ;;  %v1078_v50 = vadd.f32 %v977_v41, %v123_v37  ;;  %v1864_v41 = vld [vmem:[%s2981_s0 + $0xe4] sm:$0xf] }
  0xe1   :  { %1438 = vst.msk [vmem:[%s2983_s3 + $0x18] sm:$0xf] %vm1431_vm3, %v1373_v47  ;;  %v1209_v25 = vld [vmem:[#allocation2 + $0x130] sm:$0xff]  ;;  %v1047_v51 = vadd.f32 %v900_v48, %v92_v44  ;;  %769 = vmatmul.bf16.gmra.mxu0 %v1599_v39 }
  0xe2   :  { %v1277_v52 = vadd.f32 %v2326_v10, %v1209_v25  ;;  %v1178_v53 = vld [vmem:[#allocation2 + $0x38] sm:$0xff]  ;;  %1143 = vst.msk [vmem:[#allocation2 + $0x138] sm:$0xff] %vm19_vm2, %v1078_v50  ;;  %849 = vmatmul.bf16.gmra.mxu2 %v1727_v46  ;;  %v126_v47 = vld [vmem:[#allocation2 + $0x150] sm:$0xff] }
  0xe3   :  { %v1246_v56 = vadd.f32 %v2326_v10, %v1178_v53  ;;  %1112 = vst.msk [vmem:[#allocation2 + $0x40] sm:$0xff] %vm19_vm2, %v1047_v51  ;;  %v95_v53 = vld [vmem:[#allocation2 + $0x58] sm:$0xff] }
  0xe4   :  { %v1341_v57 = vmax.f32 %v1277_v52, 0.0 }
  0xe5   :  { %v1310_v58 = vmax.f32 %v1246_v56, 0.0  ;;  %v810_v59 = vpop.f32.mrf.mxu2 }
  0xe6   :  { %v1405_v43 = vpack.c.bf16 %v1341_v57, %v1341_v57  ;;  %v980_v62 = vadd.f32 %v2492_v60, %v810_v59  ;;  %v732_v2 = vpop.f32.mrf.mxu0  ;;  %v2569_v5 = vpop.f32.mrf.mxu3 }
  0xe7   :  { %v904_v63 = vpop.f32.mrf.mxu1  ;;  %v1374_v3 = vpack.c.bf16 %v1310_v58, %v1310_v58  ;;  %v902_v4 = vadd.f32 %v901_v42, %v732_v2  ;;  %v1616_v42 = vld [vmem:[%s2981_s0 + $0xe8] sm:$0xf0] }
  0xe8   :  { %1470 = vst.msk [vmem:[%s2983_s3 + $0x98] sm:$0xf] %vm1431_vm3, %v1405_v43  ;;  %v1079_v7 = vadd.f32 %v980_v62, %v124_v32  ;;  %v1619_v50 = vor.u32 %v1864_v41, %v1616_v42  ;;  %v1614_v32 = vld [vmem:[%s2981_s0 + $0xe0] sm:$0xf] }
  0xe9   :  { %1439 = vst.msk [vmem:[%s2983_s3 + $0x1c] sm:$0xf] %vm1431_vm3, %v1374_v3  ;;  %v1210_v60 = vld [vmem:[#allocation2 + $0x138] sm:$0xff]  ;;  %v1048_v9 = vadd.f32 %v902_v4, %v93_v1  ;;  %v1742_v3 = vld [vmem:[%s2981_s0 + $0x1e0] sm:$0xf] }
  0xea   :  { %1817 = vmatmul.msk.bf16.gmra.mxu1 %vm600_vm1, %v1611_v61  ;;  %v1278_v12 = vadd.f32 %v2326_v10, %v1210_v60  ;;  %v1179_v13 = vld [vmem:[#allocation2 + $0x40] sm:$0xff]  ;;  %1144 = vst.msk [vmem:[#allocation2 + $0x140] sm:$0xff] %vm19_vm2, %v1079_v7  ;;  %v1898_v61 = vld [vmem:[%s2981_s0 + $0x1f4] sm:$0xf]  ;;  %v1752_v1 = vld [vmem:[%s2981_s0 + $0x1f8] sm:$0xf0] }
  0xeb   :  { %v1247_v17 = vadd.f32 %v2326_v10, %v1179_v13  ;;  %1113 = vst.msk [vmem:[#allocation2 + $0x48] sm:$0xff] %vm19_vm2, %v1048_v9  ;;  %1834 = vmatmul.msk.bf16.gmra.mxu3 %vm600_vm1, %v1747_v20  ;;  %v1897_v4 = vld [vmem:[%s2981_s0 + $0x1e4] sm:$0xf0]  ;;  %v1755_v7 = vor.u32 %v1898_v61, %v1752_v1  ;;  %v127_v9 = vld [vmem:[#allocation2 + $0x158] sm:$0xff] }
  0xec   :  { %v1342_v21 = vmax.f32 %v1278_v12, 0.0  ;;  %v1743_v19 = vor.u32 %v1897_v4, %v1742_v3 }
  0xed   :  { %v1311_v0 = vmax.f32 %v1247_v17, 0.0  ;;  %v812_v24 = vpop.f32.mrf.mxu2  ;;  %v96_v17 = vld [vmem:[#allocation2 + $0x60] sm:$0xff] }
  0xee   :  { %v1406_v27 = vpack.c.bf16 %v1342_v21, %v1342_v21  ;;  %v982_v29 = vadd.f32 %v2513_v15, %v812_v24  ;;  %v735_v33 = vpop.f32.mrf.mxu0  ;;  %v2604_v36 = vpop.f32.mrf.mxu3 }
  0xef   :  { %v906_v30 = vpop.f32.mrf.mxu1  ;;  %v1375_v28 = vpack.c.bf16 %v1311_v0, %v1311_v0  ;;  %v905_v35 = vadd.f32 %v904_v63, %v735_v33  ;;  %v1865_v63 = vld [vmem:[%s2981_s0 + $0xe4] sm:$0xf0] }
  0xf0   :  { %1471 = vst.msk [vmem:[%s2983_s3 + $0x9c] sm:$0xf] %vm1431_vm3, %v1406_v27  ;;  %v1080_v37 = vadd.f32 %v982_v29, %v125_v23  ;;  %v1615_v12 = vor.u32 %v1865_v63, %v1614_v32  ;;  %v1866_v29 = vld [vmem:[%s2981_s0 + $0xf4] sm:$0xf] }
  0xf1   :  { %1440 = vst.msk [vmem:[%s2983_s3 + $0x20] sm:$0xf] %vm1431_vm3, %v1375_v28  ;;  %v1211_v15 = vld [vmem:[#allocation2 + $0x140] sm:$0xff]  ;;  %v1049_v38 = vadd.f32 %v905_v35, %v94_v31  ;;  %774 = vmatmul.bf16.gmra.mxu0 %v1607_v26 }
  0xf2   :  { %v1279_v39 = vadd.f32 %v2326_v10, %v1211_v15  ;;  %v1180_v40 = vld [vmem:[#allocation2 + $0x48] sm:$0xff]  ;;  %1145 = vst.msk [vmem:[#allocation2 + $0x148] sm:$0xff] %vm19_vm2, %v1080_v37  ;;  %854 = vmatmul.bf16.gmra.mxu2 %v1735_v34  ;;  %v128_v28 = vld [vmem:[#allocation2 + $0x160] sm:$0xff] }
  0xf3   :  { %v1248_v44 = vadd.f32 %v2326_v10, %v1180_v40  ;;  %1114 = vst.msk [vmem:[#allocation2 + $0x50] sm:$0xff] %vm19_vm2, %v1049_v38  ;;  %v97_v40 = vld [vmem:[#allocation2 + $0x68] sm:$0xff] }
  0xf4   :  { %v1343_v45 = vmax.f32 %v1279_v39, 0.0 }
  0xf5   :  { %v1312_v46 = vmax.f32 %v1248_v44, 0.0  ;;  %v815_v48 = vpop.f32.mrf.mxu2 }
  0xf6   :  { %v1407_v25 = vpack.c.bf16 %v1343_v45, %v1343_v45  ;;  %v985_v51 = vadd.f32 %v2548_v49, %v815_v48  ;;  %v737_v54 = vpop.f32.mrf.mxu0  ;;  %v2625_v57 = vpop.f32.mrf.mxu3 }
  0xf7   :  { %v909_v52 = vpop.f32.mrf.mxu1  ;;  %v1376_v55 = vpack.c.bf16 %v1312_v46, %v1312_v46  ;;  %v907_v56 = vadd.f32 %v906_v30, %v737_v54  ;;  %v1624_v30 = vld [vmem:[%s2981_s0 + $0xf8] sm:$0xf0]  ;;  %v1899_v54 = vld [vmem:[%s2981_s0 + $0x1f4] sm:$0xf0] }
  0xf8   :  { %1472 = vst.msk [vmem:[%s2983_s3 + $0xa0] sm:$0xf] %vm1431_vm3, %v1407_v25  ;;  %v1081_v58 = vadd.f32 %v985_v51, %v126_v47  ;;  %v1627_v37 = vor.u32 %v1866_v29, %v1624_v30  ;;  %v1622_v25 = vld [vmem:[%s2981_s0 + $0xf0] sm:$0xf]  ;;  %v1867_v51 = vld [vmem:[%s2981_s0 + $0xf4] sm:$0xf0] }
  0xf9   :  { %1441 = vst.msk [vmem:[%s2983_s3 + $0x24] sm:$0xf] %vm1431_vm3, %v1376_v55  ;;  %v1212_v49 = vld [vmem:[#allocation2 + $0x148] sm:$0xff]  ;;  %v1050_v59 = vadd.f32 %v907_v56, %v95_v53  ;;  %v1750_v53 = vld [vmem:[%s2981_s0 + $0x1f0] sm:$0xf] }
  0xfa   :  { %1818 = vmatmul.msk.bf16.gmra.mxu1 %vm600_vm1, %v1619_v50  ;;  %v1280_v43 = vadd.f32 %v2326_v10, %v1212_v49  ;;  %v1181_v62 = vld [vmem:[#allocation2 + $0x50] sm:$0xff]  ;;  %1146 = vst.msk [vmem:[#allocation2 + $0x150] sm:$0xff] %vm19_vm2, %v1081_v58  ;;  %v129_v58 = vld [vmem:[#allocation2 + $0x168] sm:$0xff]  ;;  %v1623_v49 = vor.u32 %v1867_v51, %v1622_v25  ;;  %v1751_v1 = vor.u32 %v1899_v54, %v1750_v53 }
  0xfb   :  { %v1249_v2 = vadd.f32 %v2326_v10, %v1181_v62  ;;  %1115 = vst.msk [vmem:[#allocation2 + $0x58] sm:$0xff] %vm19_vm2, %v1050_v59  ;;  %1835 = vmatmul.msk.bf16.gmra.mxu3 %vm600_vm1, %v1755_v7  ;;  %v98_v62 = vld [vmem:[#allocation2 + $0x70] sm:$0xff] }
  0xfc   :  { %v1344_v8 = vmax.f32 %v1280_v43, 0.0 }
  0xfd   :  { %v1313_v60 = vmax.f32 %v1249_v2, 0.0  ;;  %v817_v11 = vpop.f32.mrf.mxu2 }
  0xfe   :  { %v1408_v13 = vpack.c.bf16 %v1344_v8, %v1344_v8  ;;  %v987_v14 = vadd.f32 %v2569_v5, %v817_v11  ;;  %v740_v18 = vpop.f32.mrf.mxu0  ;;  %v2660_v0 = vpop.f32.mrf.mxu3  ;;  %v1868_v11 = vld [vmem:[%s2981_s0 + $0x104] sm:$0xf] }
  0xff   :  { %v911_v16 = vpop.f32.mrf.mxu1  ;;  %v1377_v20 = vpack.c.bf16 %v1313_v60, %v1313_v60  ;;  %v910_v21 = vadd.f32 %v909_v52, %v740_v18 }
 0x100   :  { %1473 = vst.msk [vmem:[%s2983_s3 + $0xa4] sm:$0xf] %vm1431_vm3, %v1408_v13  ;;  %v1082_v23 = vadd.f32 %v987_v14, %v127_v9 }
 0x101   :  { %1442 = vst.msk [vmem:[%s2983_s3 + $0x28] sm:$0xf] %vm1431_vm3, %v1377_v20  ;;  %v1213_v5 = vld [vmem:[#allocation2 + $0x150] sm:$0xff]  ;;  %v1051_v24 = vadd.f32 %v910_v21, %v96_v17  ;;  %779 = vmatmul.bf16.gmra.mxu0 %v1615_v12  ;;  %v1632_v12 = vld [vmem:[%s2981_s0 + $0x108] sm:$0xf0] }
 0x102   :  { %v1281_v26 = vadd.f32 %v2326_v10, %v1213_v5  ;;  %v1182_v27 = vld [vmem:[#allocation2 + $0x58] sm:$0xff]  ;;  %1147 = vst.msk [vmem:[#allocation2 + $0x158] sm:$0xff] %vm19_vm2, %v1082_v23  ;;  %859 = vmatmul.bf16.gmra.mxu2 %v1743_v19  ;;  %v130_v17 = vld [vmem:[#allocation2 + $0x170] sm:$0xff]  ;;  %v1635_v19 = vor.u32 %v1868_v11, %v1632_v12 }
 0x103   :  { %v1250_v31 = vadd.f32 %v2326_v10, %v1182_v27  ;;  %1116 = vst.msk [vmem:[#allocation2 + $0x60] sm:$0xff] %vm19_vm2, %v1051_v24  ;;  %v99_v5 = vld [vmem:[#allocation2 + $0x78] sm:$0xff] }
 0x104   :  { %v1345_v33 = vmax.f32 %v1281_v26, 0.0 }
 0x105   :  { %v1314_v34 = vmax.f32 %v1250_v31, 0.0  ;;  %v820_v35 = vpop.f32.mrf.mxu2 }
 0x106   :  { %v1409_v15 = vpack.c.bf16 %v1345_v33, %v1345_v33  ;;  %v990_v38 = vadd.f32 %v2604_v36, %v820_v35  ;;  %v742_v41 = vpop.f32.mrf.mxu0  ;;  %v2681_v45 = vpop.f32.mrf.mxu3 }
 0x107   :  { %v914_v39 = vpop.f32.mrf.mxu1  ;;  %v1378_v42 = vpack.c.bf16 %v1314_v34, %v1314_v34  ;;  %v912_v44 = vadd.f32 %v911_v16, %v742_v41 }
 0x108   :  { %1474 = vst.msk [vmem:[%s2983_s3 + $0xa8] sm:$0xf] %vm1431_vm3, %v1409_v15  ;;  %v1083_v46 = vadd.f32 %v990_v38, %v128_v28  ;;  %v131_v15 = vld [vmem:[#allocation2 + $0x178] sm:$0xff] }
 0x109   :  { %1443 = vst.msk [vmem:[%s2983_s3 + $0x2c] sm:$0xf] %vm1431_vm3, %v1378_v42  ;;  %v1214_v47 = vld [vmem:[#allocation2 + $0x158] sm:$0xff]  ;;  %v1052_v36 = vadd.f32 %v912_v44, %v97_v40  ;;  %v100_v42 = vld [vmem:[#allocation2 + $0x80] sm:$0xff] }
 0x10a   :  { %1819 = vmatmul.msk.bf16.gmra.mxu1 %vm600_vm1, %v1627_v37  ;;  %v1282_v48 = vadd.f32 %v2326_v10, %v1214_v47  ;;  %v1183_v50 = vld [vmem:[#allocation2 + $0x60] sm:$0xff]  ;;  %1148 = vst.msk [vmem:[#allocation2 + $0x160] sm:$0xff] %vm19_vm2, %v1083_v46 }
 0x10b   :  { %v1251_v52 = vadd.f32 %v2326_v10, %v1183_v50  ;;  %1117 = vst.msk [vmem:[#allocation2 + $0x68] sm:$0xff] %vm19_vm2, %v1052_v36 }
 0x10c   :  { %v1346_v55 = vmax.f32 %v1282_v48, 0.0 }
 0x10d   :  { %v1315_v56 = vmax.f32 %v1251_v52, 0.0  ;;  %v822_v32 = vpop.f32.mrf.mxu2 }
 0x10e   :  { %v1410_v59 = vpack.c.bf16 %v1346_v55, %v1346_v55  ;;  %v992_v61 = vadd.f32 %v2625_v57, %v822_v32  ;;  %v745_v63 = vpop.f32.mrf.mxu0  ;;  %v2709_v4 = vpop.f32.mrf.mxu3  ;;  %v132_v55 = vld [vmem:[#allocation2 + $0x180] sm:$0xff] }
 0x10f   :  { %v916_v43 = vpop.f32.mrf.mxu1  ;;  %v1379_v2 = vpack.c.bf16 %v1315_v56, %v1315_v56  ;;  %v915_v3 = vadd.f32 %v914_v39, %v745_v63 }
 0x110   :  { %1475 = vst.msk [vmem:[%s2983_s3 + $0xac] sm:$0xf] %vm1431_vm3, %v1410_v59  ;;  %v1084_v7 = vadd.f32 %v992_v61, %v129_v58  ;;  %v101_v59 = vld [vmem:[#allocation2 + $0x88] sm:$0xff] }
 0x111   :  { %1444 = vst.msk [vmem:[%s2983_s3 + $0x30] sm:$0xf] %vm1431_vm3, %v1379_v2  ;;  %v1215_v57 = vld [vmem:[#allocation2 + $0x160] sm:$0xff]  ;;  %v1053_v8 = vadd.f32 %v915_v3, %v98_v62  ;;  %784 = vmatmul.bf16.gmra.mxu0 %v1623_v49 }
 0x112   :  { %v1283_v60 = vadd.f32 %v2326_v10, %v1215_v57  ;;  %v1184_v9 = vld [vmem:[#allocation2 + $0x68] sm:$0xff]  ;;  %1149 = vst.msk [vmem:[#allocation2 + $0x168] sm:$0xff] %vm19_vm2, %v1084_v7  ;;  %864 = vmatmul.bf16.gmra.mxu2 %v1751_v1 }
 0x113   :  { %v1252_v13 = vadd.f32 %v2326_v10, %v1184_v9  ;;  %1118 = vst.msk [vmem:[#allocation2 + $0x70] sm:$0xff] %vm19_vm2, %v1053_v8  ;;  %v133_v9 = vld [vmem:[#allocation2 + $0x188] sm:$0xff] }
 0x114   :  { %v1347_v14 = vmax.f32 %v1283_v60, 0.0 }
 0x115   :  { %v1316_v16 = vmax.f32 %v1252_v13, 0.0  ;;  %v825_v18 = vpop.f32.mrf.mxu2 }
 0x116   :  { %v1411_v20 = vpack.c.bf16 %v1347_v14, %v1347_v14  ;;  %v995_v21 = vadd.f32 %v2660_v0, %v825_v18  ;;  %v747_v24 = vpop.f32.mrf.mxu0  ;;  %v1001_v29 = vpop.f32.mrf.mxu3 }
 0x117   :  { %v919_v23 = vpop.f32.mrf.mxu1  ;;  %v1380_v26 = vpack.c.bf16 %v1316_v16, %v1316_v16  ;;  %v917_v27 = vadd.f32 %v916_v43, %v747_v24  ;;  %v102_v16 = vld [vmem:[#allocation2 + $0x90] sm:$0xff] }
 0x118   :  { %1476 = vst.msk [vmem:[%s2983_s3 + $0xb0] sm:$0xf] %vm1431_vm3, %v1411_v20  ;;  %v1085_v30 = vadd.f32 %v995_v21, %v130_v17 }
 0x119   :  { %1445 = vst.msk [vmem:[%s2983_s3 + $0x34] sm:$0xf] %vm1431_vm3, %v1380_v26  ;;  %v1216_v31 = vld [vmem:[#allocation2 + $0x168] sm:$0xff]  ;;  %v1054_v33 = vadd.f32 %v917_v27, %v99_v5 }
 0x11a   :  { %1820 = vmatmul.msk.bf16.gmra.mxu1 %vm600_vm1, %v1635_v19  ;;  %v1284_v0 = vadd.f32 %v2326_v10, %v1216_v31  ;;  %v1185_v34 = vld [vmem:[#allocation2 + $0x70] sm:$0xff]  ;;  %1150 = vst.msk [vmem:[#allocation2 + $0x170] sm:$0xff] %vm19_vm2, %v1085_v30 }
 0x11b   :  { %v1253_v28 = vadd.f32 %v2326_v10, %v1185_v34  ;;  %1119 = vst.msk [vmem:[#allocation2 + $0x78] sm:$0xff] %vm19_vm2, %v1054_v33  ;;  %v134_v31 = vld [vmem:[#allocation2 + $0x190] sm:$0xff] }
 0x11c   :  { %v1348_v35 = vmax.f32 %v1284_v0, 0.0 }
 0x11d   :  { %v1317_v37 = vmax.f32 %v1253_v28, 0.0  ;;  %v827_v38 = vpop.f32.mrf.mxu2 }
 0x11e   :  { %v1412_v39 = vpack.c.bf16 %v1348_v35, %v1348_v35  ;;  %v997_v40 = vadd.f32 %v2681_v45, %v827_v38  ;;  %v750_v44 = vpop.f32.mrf.mxu0  ;;  %v1004_v36 = vpop.f32.mrf.mxu3  ;;  %v103_v35 = vld [vmem:[#allocation2 + $0x98] sm:$0xff] }
 0x11f   :  { %v921_v41 = vpop.f32.mrf.mxu1  ;;  %v1381_v46 = vpack.c.bf16 %v1317_v37, %v1317_v37  ;;  %v920_v47 = vadd.f32 %v919_v23, %v750_v44 }
 0x120   :  { %1477 = vst.msk [vmem:[%s2983_s3 + $0xb4] sm:$0xf] %vm1431_vm3, %v1412_v39  ;;  %v1086_v48 = vadd.f32 %v997_v40, %v131_v15 }
 0x121   :  { %1446 = vst.msk [vmem:[%s2983_s3 + $0x38] sm:$0xf] %vm1431_vm3, %v1381_v46  ;;  %v1217_v50 = vld [vmem:[#allocation2 + $0x170] sm:$0xff]  ;;  %v1055_v25 = vadd.f32 %v920_v47, %v100_v42  ;;  %v2792_v42 = vld [vmem:[%s2982_s2] ss:$0 sm:$0xff] }
 0x122   :  { %v1285_v45 = vadd.f32 %v2326_v10, %v1217_v50  ;;  %v1186_v51 = vld [vmem:[#allocation2 + $0x78] sm:$0xff]  ;;  %1151 = vst.msk [vmem:[#allocation2 + $0x178] sm:$0xff] %vm19_vm2, %v1086_v48 }
 0x123   :  { %v1254_v52 = vadd.f32 %v2326_v10, %v1186_v51  ;;  %1120 = vst.msk [vmem:[#allocation2 + $0x80] sm:$0xff] %vm19_vm2, %v1055_v25  ;;  %v135_v50 = vld [vmem:[#allocation2 + $0x198] sm:$0xff] }
 0x124   :  { %v1349_v53 = vmax.f32 %v1285_v45, 0.0 }
 0x125   :  { %v1318_v54 = vmax.f32 %v1254_v52, 0.0  ;;  %v830_v56 = vpop.f32.mrf.mxu2 }
 0x126   :  { %v1413_v58 = vpack.c.bf16 %v1349_v53, %v1349_v53  ;;  %v1000_v32 = vadd.f32 %v2709_v4, %v830_v56  ;;  %v752_v61 = vpop.f32.mrf.mxu0  ;;  %v1006_v63 = vpop.f32.mrf.mxu3  ;;  %v104_v53 = vld [vmem:[#allocation2 + $0xa0] sm:$0xff] }
 0x127   :  { %v924_v49 = vpop.f32.mrf.mxu1  ;;  %v1382_v43 = vpack.c.bf16 %v1318_v54, %v1318_v54  ;;  %v922_v62 = vadd.f32 %v921_v41, %v752_v61 }
 0x128   :  { %1478 = vst.msk [vmem:[%s2983_s3 + $0xb8] sm:$0xf] %vm1431_vm3, %v1413_v58  ;;  %v1087_v1 = vadd.f32 %v1000_v32, %v132_v55 }
 0x129   :  { %1447 = vst.msk [vmem:[%s2983_s3 + $0x3c] sm:$0xf] %vm1431_vm3, %v1382_v43  ;;  %v1218_v2 = vld [vmem:[#allocation2 + $0x178] sm:$0xff]  ;;  %v1056_v3 = vadd.f32 %v922_v62, %v101_v59 }
 0x12a   :  { %v1286_v4 = vadd.f32 %v2326_v10, %v1218_v2  ;;  %v1187_v7 = vld [vmem:[#allocation2 + $0x80] sm:$0xff]  ;;  %1152 = vst.msk [vmem:[#allocation2 + $0x180] sm:$0xff] %vm19_vm2, %v1087_v1 }
 0x12b   :  { %v1255_v57 = vadd.f32 %v2326_v10, %v1187_v7  ;;  %1121 = vst.msk [vmem:[#allocation2 + $0x88] sm:$0xff] %vm19_vm2, %v1056_v3  ;;  %v136_v2 = vld [vmem:[#allocation2 + $0x1a0] sm:$0xff] }
 0x12c   :  { %v1350_v8 = vmax.f32 %v1286_v4, 0.0 }
 0x12d   :  { %v1319_v60 = vmax.f32 %v1255_v57, 0.0  ;;  %v832_v11 = vpop.f32.mrf.mxu2 }
 0x12e   :  { %v1414_v12 = vpack.c.bf16 %v1350_v8, %v1350_v8  ;;  %v1002_v13 = vadd.f32 %v1001_v29, %v832_v11  ;;  %v755_v17 = vpop.f32.mrf.mxu0  ;;  %v1009_v21 = vpop.f32.mrf.mxu3  ;;  %v105_v8 = vld [vmem:[#allocation2 + $0xa8] sm:$0xff] }
 0x12f   :  { %v926_v14 = vpop.f32.mrf.mxu1  ;;  %v1383_v18 = vpack.c.bf16 %v1319_v60, %v1319_v60  ;;  %v925_v19 = vadd.f32 %v924_v49, %v755_v17 }
 0x130   :  { %1479 = vst.msk [vmem:[%s2983_s3 + $0xbc] sm:$0xf] %vm1431_vm3, %v1414_v12  ;;  %v1088_v20 = vadd.f32 %v1002_v13, %v133_v9 }
 0x131   :  { %1448 = vst.msk [vmem:[%s2983_s3 + $0x40] sm:$0xf] %vm1431_vm3, %v1383_v18  ;;  %v1219_v23 = vld [vmem:[#allocation2 + $0x180] sm:$0xff]  ;;  %v1057_v5 = vadd.f32 %v925_v19, %v102_v16 }
 0x132   :  { %v1287_v24 = vadd.f32 %v2326_v10, %v1219_v23  ;;  %v1188_v26 = vld [vmem:[#allocation2 + $0x88] sm:$0xff]  ;;  %1153 = vst.msk [vmem:[#allocation2 + $0x188] sm:$0xff] %vm19_vm2, %v1088_v20 }
 0x133   :  { %v1256_v27 = vadd.f32 %v2326_v10, %v1188_v26  ;;  %1122 = vst.msk [vmem:[#allocation2 + $0x90] sm:$0xff] %vm19_vm2, %v1057_v5 }
 0x134   :  { %v1351_v29 = vmax.f32 %v1287_v24, 0.0 }
 0x135   :  { %v1320_v30 = vmax.f32 %v1256_v27, 0.0  ;;  %v835_v33 = vpop.f32.mrf.mxu2 }
 0x136   :  { %v1415_v0 = vpack.c.bf16 %v1351_v29, %v1351_v29  ;;  %v1005_v34 = vadd.f32 %v1004_v36, %v835_v33  ;;  %v757_v37 = vpop.f32.mrf.mxu0  ;;  %v1011_v41 = vpop.f32.mrf.mxu3  ;;  %v106_v29 = vld [vmem:[#allocation2 + $0xb0] sm:$0xff] }
 0x137   :  { %v929_v28 = vpop.f32.mrf.mxu1  ;;  %v1384_v15 = vpack.c.bf16 %v1320_v30, %v1320_v30  ;;  %v927_v38 = vadd.f32 %v926_v14, %v757_v37 }
 0x138   :  { %1480 = vst.msk [vmem:[%s2983_s3 + $0xc0] sm:$0xf] %vm1431_vm3, %v1415_v0  ;;  %v1089_v39 = vadd.f32 %v1005_v34, %v134_v31 }
 0x139   :  { %1449 = vst.msk [vmem:[%s2983_s3 + $0x44] sm:$0xf] %vm1431_vm3, %v1384_v15  ;;  %v1220_v10 = vld [vmem:[#allocation2 + $0x188] sm:$0xff]  ;;  %v1058_v40 = vadd.f32 %v927_v38, %v103_v35 }
 0x13a   :  { %v1288_v44 = vadd.f32 %v2792_v42, %v1220_v10  ;;  %v1189_v46 = vld [vmem:[#allocation2 + $0x90] sm:$0xff]  ;;  %1154 = vst.msk [vmem:[#allocation2 + $0x190] sm:$0xff] %vm19_vm2, %v1089_v39 }
 0x13b   :  { %v1257_v47 = vadd.f32 %v2792_v42, %v1189_v46  ;;  %1123 = vst.msk [vmem:[#allocation2 + $0x98] sm:$0xff] %vm19_vm2, %v1058_v40  ;;  %v138_v10 = vld [vmem:[#allocation2 + $0x1b0] sm:$0xff] }
 0x13c   :  { %v1352_v36 = vmax.f32 %v1288_v44, 0.0 }
 0x13d   :  { %v1321_v48 = vmax.f32 %v1257_v47, 0.0  ;;  %v837_v25 = vpop.f32.mrf.mxu2  ;;  %v107_v47 = vld [vmem:[#allocation2 + $0xb8] sm:$0xff] }
 0x13e   :  { %v1416_v45 = vpack.c.bf16 %v1352_v36, %v1352_v36  ;;  %v1007_v51 = vadd.f32 %v1006_v63, %v837_v25  ;;  %v760_v54 = vpop.f32.mrf.mxu0  ;;  %v1014_v62 = vpop.f32.mrf.mxu3 }
 0x13f   :  { %v931_v52 = vpop.f32.mrf.mxu1  ;;  %v1385_v55 = vpack.c.bf16 %v1321_v48, %v1321_v48  ;;  %v930_v56 = vadd.f32 %v929_v28, %v760_v54 }
 0x140   :  { %1481 = vst.msk [vmem:[%s2983_s3 + $0xc4] sm:$0xf] %vm1431_vm3, %v1416_v45  ;;  %v1090_v58 = vadd.f32 %v1007_v51, %v135_v50 }
 0x141   :  { %1450 = vst.msk [vmem:[%s2983_s3 + $0x48] sm:$0xf] %vm1431_vm3, %v1385_v55  ;;  %v1221_v32 = vld [vmem:[#allocation2 + $0x190] sm:$0xff]  ;;  %v1059_v49 = vadd.f32 %v930_v56, %v104_v53 }
 0x142   :  { %v1289_v59 = vadd.f32 %v2792_v42, %v1221_v32  ;;  %v1190_v61 = vld [vmem:[#allocation2 + $0x98] sm:$0xff]  ;;  %1155 = vst.msk [vmem:[#allocation2 + $0x198] sm:$0xff] %vm19_vm2, %v1090_v58 }
 0x143   :  { %v1258_v43 = vadd.f32 %v2792_v42, %v1190_v61  ;;  %1124 = vst.msk [vmem:[#allocation2 + $0xa0] sm:$0xff] %vm19_vm2, %v1059_v49  ;;  %v139_v32 = vld [vmem:[#allocation2 + $0x1b8] sm:$0xff] }
 0x144   :  { %v1353_v63 = vmax.f32 %v1289_v59, 0.0 }
 0x145   :  { %v1322_v1 = vmax.f32 %v1258_v43, 0.0  ;;  %v840_v3 = vpop.f32.mrf.mxu2 }
 0x146   :  { %v1417_v4 = vpack.c.bf16 %v1353_v63, %v1353_v63  ;;  %v1010_v7 = vadd.f32 %v1009_v21, %v840_v3  ;;  %v762_v60 = vpop.f32.mrf.mxu0  ;;  %v137_v21 = vld [vmem:[#allocation2 + $0x1a8] sm:$0xff]  ;;  %v1016_v5 = vpop.f32.mrf.mxu3 }
 0x147   :  { %v934_v57 = vpop.f32.mrf.mxu1  ;;  %v1386_v9 = vpack.c.bf16 %v1322_v1, %v1322_v1  ;;  %v932_v11 = vadd.f32 %v931_v52, %v762_v60 }
 0x148   :  { %1482 = vst.msk [vmem:[%s2983_s3 + $0xc8] sm:$0xf] %vm1431_vm3, %v1417_v4  ;;  %v1091_v12 = vadd.f32 %v1010_v7, %v136_v2 }
 0x149   :  { %1451 = vst.msk [vmem:[%s2983_s3 + $0x4c] sm:$0xf] %vm1431_vm3, %v1386_v9  ;;  %v1222_v13 = vld [vmem:[#allocation2 + $0x198] sm:$0xff]  ;;  %v1060_v14 = vadd.f32 %v932_v11, %v105_v8 }
 0x14a   :  { %v1290_v16 = vadd.f32 %v2792_v42, %v1222_v13  ;;  %v1191_v17 = vld [vmem:[#allocation2 + $0xa0] sm:$0xff]  ;;  %1156 = vst.msk [vmem:[#allocation2 + $0x1a0] sm:$0xff] %vm19_vm2, %v1091_v12 }
 0x14b   :  { %v1259_v18 = vadd.f32 %v2792_v42, %v1191_v17  ;;  %1125 = vst.msk [vmem:[#allocation2 + $0xa8] sm:$0xff] %vm19_vm2, %v1060_v14  ;;  %v140_v13 = vld [vmem:[#allocation2 + $0x1c0] sm:$0xff] }
 0x14c   :  { %v1354_v19 = vmax.f32 %v1290_v16, 0.0 }
 0x14d   :  { %v1323_v20 = vmax.f32 %v1259_v18, 0.0  ;;  %v842_v23 = vpop.f32.mrf.mxu2 }
 0x14e   :  { %v1418_v24 = vpack.c.bf16 %v1354_v19, %v1354_v19  ;;  %v1012_v26 = vadd.f32 %v1011_v41, %v842_v23  ;;  %v765_v30 = vpop.f32.mrf.mxu0  ;;  %v1019_v25 = vpop.f32.mrf.mxu3  ;;  %v109_v19 = vld [vmem:[#allocation2 + $0xc8] sm:$0xff] }
 0x14f   :  { %v936_v27 = vpop.f32.mrf.mxu1  ;;  %v1387_v31 = vpack.c.bf16 %v1323_v20, %v1323_v20  ;;  %v935_v33 = vadd.f32 %v934_v57, %v765_v30 }
 0x150   :  { %1483 = vst.msk [vmem:[%s2983_s3 + $0xcc] sm:$0xf] %vm1431_vm3, %v1418_v24  ;;  %v1092_v0 = vadd.f32 %v1012_v26, %v137_v21 }
 0x151   :  { %1452 = vst.msk [vmem:[%s2983_s3 + $0x50] sm:$0xf] %vm1431_vm3, %v1387_v31  ;;  %v1223_v34 = vld [vmem:[#allocation2 + $0x1a0] sm:$0xff]  ;;  %v1061_v28 = vadd.f32 %v935_v33, %v106_v29 }
 0x152   :  { %v1291_v35 = vadd.f32 %v2792_v42, %v1223_v34  ;;  %v1192_v37 = vld [vmem:[#allocation2 + $0xa8] sm:$0xff]  ;;  %1157 = vst.msk [vmem:[#allocation2 + $0x1a8] sm:$0xff] %vm19_vm2, %v1092_v0 }
 0x153   :  { %v1260_v15 = vadd.f32 %v2792_v42, %v1192_v37  ;;  %1126 = vst.msk [vmem:[#allocation2 + $0xb0] sm:$0xff] %vm19_vm2, %v1061_v28  ;;  %v141_v34 = vld [vmem:[#allocation2 + $0x1c8] sm:$0xff] }
 0x154   :  { %v1355_v38 = vmax.f32 %v1291_v35, 0.0 }
 0x155   :  { %v1324_v39 = vmax.f32 %v1260_v15, 0.0  ;;  %v845_v40 = vpop.f32.mrf.mxu2 }
 0x156   :  { %v1419_v41 = vpack.c.bf16 %v1355_v38, %v1355_v38  ;;  %v1015_v44 = vadd.f32 %v1014_v62, %v845_v40  ;;  %v767_v36 = vpop.f32.mrf.mxu0  ;;  %v108_v62 = vld [vmem:[#allocation2 + $0xc0] sm:$0xff]  ;;  %v1021_v57 = vpop.f32.mrf.mxu3  ;;  %v110_v38 = vld [vmem:[#allocation2 + $0xd0] sm:$0xff] }
 0x157   :  { %v939_v46 = vpop.f32.mrf.mxu1  ;;  %v1388_v48 = vpack.c.bf16 %v1324_v39, %v1324_v39  ;;  %v937_v50 = vadd.f32 %v936_v27, %v767_v36 }
 0x158   :  { %1484 = vst.msk [vmem:[%s2983_s3 + $0xd0] sm:$0xf] %vm1431_vm3, %v1419_v41  ;;  %v1093_v45 = vadd.f32 %v1015_v44, %v138_v10 }
 0x159   :  { %1453 = vst.msk [vmem:[%s2983_s3 + $0x54] sm:$0xf] %vm1431_vm3, %v1388_v48  ;;  %v1224_v51 = vld [vmem:[#allocation2 + $0x1a8] sm:$0xff]  ;;  %v1062_v52 = vadd.f32 %v937_v50, %v107_v47 }
 0x15a   :  { %v1292_v53 = vadd.f32 %v2792_v42, %v1224_v51  ;;  %v1193_v54 = vld [vmem:[#allocation2 + $0xb0] sm:$0xff]  ;;  %1158 = vst.msk [vmem:[#allocation2 + $0x1b0] sm:$0xff] %vm19_vm2, %v1093_v45 }
 0x15b   :  { %v1261_v55 = vadd.f32 %v2792_v42, %v1193_v54  ;;  %1127 = vst.msk [vmem:[#allocation2 + $0xb8] sm:$0xff] %vm19_vm2, %v1062_v52  ;;  %v142_v45 = vld [vmem:[#allocation2 + $0x1d0] sm:$0xff] }
 0x15c   :  { %v1356_v56 = vmax.f32 %v1292_v53, 0.0 }
 0x15d   :  { %v1325_v58 = vmax.f32 %v1261_v55, 0.0  ;;  %v847_v49 = vpop.f32.mrf.mxu2 }
 0x15e   :  { %v1420_v59 = vpack.c.bf16 %v1356_v56, %v1356_v56  ;;  %v1017_v61 = vadd.f32 %v1016_v5, %v847_v49  ;;  %v770_v63 = vpop.f32.mrf.mxu0  ;;  %v1024_v31 = vpop.f32.mrf.mxu3  ;;  %v111_v56 = vld [vmem:[#allocation2 + $0xd8] sm:$0xff] }
 0x15f   :  { %v941_v43 = vpop.f32.mrf.mxu1  ;;  %v1389_v1 = vpack.c.bf16 %v1325_v58, %v1325_v58  ;;  %v940_v2 = vadd.f32 %v939_v46, %v770_v63 }
 0x160   :  { %1485 = vst.msk [vmem:[%s2983_s3 + $0xd4] sm:$0xf] %vm1431_vm3, %v1420_v59  ;;  %v1094_v3 = vadd.f32 %v1017_v61, %v139_v32 }
 0x161   :  { %1454 = vst.msk [vmem:[%s2983_s3 + $0x58] sm:$0xf] %vm1431_vm3, %v1389_v1  ;;  %v1225_v4 = vld [vmem:[#allocation2 + $0x1b0] sm:$0xff]  ;;  %v1063_v7 = vadd.f32 %v940_v2, %v108_v62 }
 0x162   :  { %v1293_v8 = vadd.f32 %v2792_v42, %v1225_v4  ;;  %v1194_v60 = vld [vmem:[#allocation2 + $0xb8] sm:$0xff]  ;;  %1159 = vst.msk [vmem:[#allocation2 + $0x1b8] sm:$0xff] %vm19_vm2, %v1094_v3 }
 0x163   :  { %v1262_v9 = vadd.f32 %v2792_v42, %v1194_v60  ;;  %1128 = vst.msk [vmem:[#allocation2 + $0xc0] sm:$0xff] %vm19_vm2, %v1063_v7  ;;  %v143_v4 = vld [vmem:[#allocation2 + $0x1d8] sm:$0xff] }
 0x164   :  { %v1357_v11 = vmax.f32 %v1293_v8, 0.0 }
 0x165   :  { %v1326_v12 = vmax.f32 %v1262_v9, 0.0  ;;  %v850_v14 = vpop.f32.mrf.mxu2  ;;  %v112_v9 = vld [vmem:[#allocation2 + $0xe0] sm:$0xff] }
 0x166   :  { %v1421_v16 = vpack.c.bf16 %v1357_v11, %v1357_v11  ;;  %v1020_v17 = vadd.f32 %v1019_v25, %v850_v14  ;;  %v772_v20 = vpop.f32.mrf.mxu0  ;;  %v1026_v52 = vpop.f32.mrf.mxu3 }
 0x167   :  { %v944_v18 = vpop.f32.mrf.mxu1  ;;  %v1390_v21 = vpack.c.bf16 %v1326_v12, %v1326_v12  ;;  %v942_v23 = vadd.f32 %v941_v43, %v772_v20 }
 0x168   :  { %1486 = vst.msk [vmem:[%s2983_s3 + $0xd8] sm:$0xf] %vm1431_vm3, %v1421_v16  ;;  %v1095_v5 = vadd.f32 %v1020_v17, %v140_v13 }
 0x169   :  { %1455 = vst.msk [vmem:[%s2983_s3 + $0x5c] sm:$0xf] %vm1431_vm3, %v1390_v21  ;;  %v1226_v24 = vld [vmem:[#allocation2 + $0x1b8] sm:$0xff]  ;;  %v1064_v26 = vadd.f32 %v942_v23, %v109_v19 }
 0x16a   :  { %v1294_v27 = vadd.f32 %v2792_v42, %v1226_v24  ;;  %v1195_v29 = vld [vmem:[#allocation2 + $0xc0] sm:$0xff]  ;;  %1160 = vst.msk [vmem:[#allocation2 + $0x1c0] sm:$0xff] %vm19_vm2, %v1095_v5 }
 0x16b   :  { %v1263_v30 = vadd.f32 %v2792_v42, %v1195_v29  ;;  %1129 = vst.msk [vmem:[#allocation2 + $0xc8] sm:$0xff] %vm19_vm2, %v1064_v26  ;;  %v144_v24 = vld [vmem:[#allocation2 + $0x1e0] sm:$0xff] }
 0x16c   :  { %v1358_v33 = vmax.f32 %v1294_v27, 0.0 }
 0x16d   :  { %v1327_v0 = vmax.f32 %v1263_v30, 0.0  ;;  %v852_v28 = vpop.f32.mrf.mxu2 }
 0x16e   :  { %v1422_v35 = vpack.c.bf16 %v1358_v33, %v1358_v33  ;;  %v1022_v37 = vadd.f32 %v1021_v57, %v852_v28  ;;  %v775_v39 = vpop.f32.mrf.mxu0  ;;  %v1029_v13 = vpop.f32.mrf.mxu3 }
 0x16f   :  { %v946_v15 = vpop.f32.mrf.mxu1  ;;  %v1391_v10 = vpack.c.bf16 %v1327_v0, %v1327_v0  ;;  %v945_v40 = vadd.f32 %v944_v18, %v775_v39 }
 0x170   :  { %1487 = vst.msk [vmem:[%s2983_s3 + $0xdc] sm:$0xf] %vm1431_vm3, %v1422_v35  ;;  %v1096_v41 = vadd.f32 %v1022_v37, %v141_v34 }
 0x171   :  { %1456 = vst.msk [vmem:[%s2983_s3 + $0x60] sm:$0xf] %vm1431_vm3, %v1391_v10  ;;  %v1227_v44 = vld [vmem:[#allocation2 + $0x1c0] sm:$0xff]  ;;  %v1065_v46 = vadd.f32 %v945_v40, %v110_v38 }
 0x172   :  { %v1295_v47 = vadd.f32 %v2792_v42, %v1227_v44  ;;  %v1196_v36 = vld [vmem:[#allocation2 + $0xc8] sm:$0xff]  ;;  %1161 = vst.msk [vmem:[#allocation2 + $0x1c8] sm:$0xff] %vm19_vm2, %v1096_v41 }
 0x173   :  { %v1264_v48 = vadd.f32 %v2792_v42, %v1196_v36  ;;  %1130 = vst.msk [vmem:[#allocation2 + $0xd0] sm:$0xff] %vm19_vm2, %v1065_v46  ;;  %v145_v44 = vld [vmem:[#allocation2 + $0x1e8] sm:$0xff] }
 0x174   :  { %v1359_v50 = vmax.f32 %v1295_v47, 0.0 }
 0x175   :  { %v1328_v25 = vmax.f32 %v1264_v48, 0.0  ;;  %v855_v51 = vpop.f32.mrf.mxu2 }
 0x176   :  { %v1423_v53 = vpack.c.bf16 %v1359_v50, %v1359_v50  ;;  %v1025_v54 = vadd.f32 %v1024_v31, %v855_v51  ;;  %v777_v58 = vpop.f32.mrf.mxu0  ;;  %v113_v31 = vld [vmem:[#allocation2 + $0xe8] sm:$0xff]  ;;  %v1031_v37 = vpop.f32.mrf.mxu3  ;;  %v114_v50 = vld [vmem:[#allocation2 + $0xf0] sm:$0xff] }
 0x177   :  { %v949_v55 = vpop.f32.mrf.mxu1  ;;  %v1392_v32 = vpack.c.bf16 %v1328_v25, %v1328_v25  ;;  %v947_v49 = vadd.f32 %v946_v15, %v777_v58 }
 0x178   :  { %1488 = vst.msk [vmem:[%s2983_s3 + $0xe0] sm:$0xf] %vm1431_vm3, %v1423_v53  ;;  %v1097_v59 = vadd.f32 %v1025_v54, %v142_v45 }
 0x179   :  { %1457 = vst.msk [vmem:[%s2983_s3 + $0x64] sm:$0xf] %vm1431_vm3, %v1392_v32  ;;  %v1228_v61 = vld [vmem:[#allocation2 + $0x1c8] sm:$0xff]  ;;  %v1066_v43 = vadd.f32 %v947_v49, %v111_v56 }
 0x17a   :  { %v1296_v62 = vadd.f32 %v2792_v42, %v1228_v61  ;;  %v1197_v63 = vld [vmem:[#allocation2 + $0xd0] sm:$0xff]  ;;  %1162 = vst.msk [vmem:[#allocation2 + $0x1d0] sm:$0xff] %vm19_vm2, %v1097_v59 }
 0x17b   :  { %v1265_v1 = vadd.f32 %v2792_v42, %v1197_v63  ;;  %1131 = vst.msk [vmem:[#allocation2 + $0xd8] sm:$0xff] %vm19_vm2, %v1066_v43  ;;  %v146_v61 = vld [vmem:[#allocation2 + $0x1f0] sm:$0xff] }
 0x17c   :  { %v1360_v2 = vmax.f32 %v1296_v62, 0.0 }
 0x17d   :  { %v1329_v3 = vmax.f32 %v1265_v1, 0.0  ;;  %v857_v7 = vpop.f32.mrf.mxu2  ;;  %v116_v1 = vld [vmem:[#allocation2 + $0x100] sm:$0xff] }
 0x17e   :  { %v1424_v57 = vpack.c.bf16 %v1360_v2, %v1360_v2  ;;  %v1027_v8 = vadd.f32 %v1026_v52, %v857_v7  ;;  %v780_v11 = vpop.f32.mrf.mxu0  ;;  %v1034_v32 = vpop.f32.mrf.mxu3 }
 0x17f   :  { %v951_v60 = vpop.f32.mrf.mxu1  ;;  %v1393_v12 = vpack.c.bf16 %v1329_v3, %v1329_v3  ;;  %v950_v14 = vadd.f32 %v949_v55, %v780_v11  ;;  %v115_v3 = vld [vmem:[#allocation2 + $0xf8] sm:$0xff] }
 0x180   :  { %1489 = vst.msk [vmem:[%s2983_s3 + $0xe4] sm:$0xf] %vm1431_vm3, %v1424_v57  ;;  %v1098_v16 = vadd.f32 %v1027_v8, %v143_v4 }
 0x181   :  { %1458 = vst.msk [vmem:[%s2983_s3 + $0x68] sm:$0xf] %vm1431_vm3, %v1393_v12  ;;  %v1229_v17 = vld [vmem:[#allocation2 + $0x1d0] sm:$0xff]  ;;  %v1067_v18 = vadd.f32 %v950_v14, %v112_v9 }
 0x182   :  { %v1297_v19 = vadd.f32 %v2792_v42, %v1229_v17  ;;  %v1198_v20 = vld [vmem:[#allocation2 + $0xd8] sm:$0xff]  ;;  %1163 = vst.msk [vmem:[#allocation2 + $0x1d8] sm:$0xff] %vm19_vm2, %v1098_v16 }
 0x183   :  { %v1266_v21 = vadd.f32 %v2792_v42, %v1198_v20  ;;  %1132 = vst.msk [vmem:[#allocation2 + $0xe0] sm:$0xff] %vm19_vm2, %v1067_v18 }
 0x184   :  { %v1361_v23 = vmax.f32 %v1297_v19, 0.0  ;;  %v147_v19 = vld [vmem:[#allocation2 + $0x1f8] sm:$0xff] }
 0x185   :  { %v1330_v5 = vmax.f32 %v1266_v21, 0.0  ;;  %v860_v26 = vpop.f32.mrf.mxu2 }
 0x186   :  { %v1425_v27 = vpack.c.bf16 %v1361_v23, %v1361_v23  ;;  %v1030_v29 = vadd.f32 %v1029_v13, %v860_v26  ;;  %v782_v33 = vpop.f32.mrf.mxu0  ;;  %v1036_v18 = vpop.f32.mrf.mxu3 }
 0x187   :  { %v954_v30 = vpop.f32.mrf.mxu1  ;;  %v1394_v0 = vpack.c.bf16 %v1330_v5, %v1330_v5  ;;  %v952_v34 = vadd.f32 %v951_v60, %v782_v33  ;;  %v117_v5 = vld [vmem:[#allocation2 + $0x108] sm:$0xff] }
 0x188   :  { %1490 = vst.msk [vmem:[%s2983_s3 + $0xe8] sm:$0xf] %vm1431_vm3, %v1425_v27  ;;  %v1099_v28 = vadd.f32 %v1030_v29, %v144_v24 }
 0x189   :  { %1459 = vst.msk [vmem:[%s2983_s3 + $0x6c] sm:$0xf] %vm1431_vm3, %v1394_v0  ;;  %v1230_v35 = vld [vmem:[#allocation2 + $0x1d8] sm:$0xff]  ;;  %v1068_v15 = vadd.f32 %v952_v34, %v113_v31 }
 0x18a   :  { %v1298_v38 = vadd.f32 %v2792_v42, %v1230_v35  ;;  %v1199_v39 = vld [vmem:[#allocation2 + $0xe0] sm:$0xff]  ;;  %1164 = vst.msk [vmem:[#allocation2 + $0x1e0] sm:$0xff] %vm19_vm2, %v1099_v28 }
 0x18b   :  { %v1267_v10 = vadd.f32 %v2792_v42, %v1199_v39  ;;  %1133 = vst.msk [vmem:[#allocation2 + $0xe8] sm:$0xff] %vm19_vm2, %v1068_v15 }
 0x18c   :  { %v1362_v40 = vmax.f32 %v1298_v38, 0.0 }
 0x18d   :  { %v1331_v41 = vmax.f32 %v1267_v10, 0.0  ;;  %v862_v46 = vpop.f32.mrf.mxu2 }
 0x18e   :  { %v1426_v47 = vpack.c.bf16 %v1362_v40, %v1362_v40  ;;  %v1032_v36 = vadd.f32 %v1031_v37, %v862_v46  ;;  %v785_v25 = vpop.f32.mrf.mxu0 }
 0x18f   :  { %v956_v48 = vpop.f32.mrf.mxu1  ;;  %v1395_v45 = vpack.c.bf16 %v1331_v41, %v1331_v41  ;;  %v955_v51 = vadd.f32 %v954_v30, %v785_v25 }
 0x190   :  { %1491 = vst.msk [vmem:[%s2983_s3 + $0xec] sm:$0xf] %vm1431_vm3, %v1426_v47  ;;  %v1100_v52 = vadd.f32 %v1032_v36, %v145_v44 }
 0x191   :  { %1460 = vst.msk [vmem:[%s2983_s3 + $0x70] sm:$0xf] %vm1431_vm3, %v1395_v45  ;;  %v1231_v53 = vld [vmem:[#allocation2 + $0x1e0] sm:$0xff]  ;;  %v1069_v54 = vadd.f32 %v955_v51, %v114_v50 }
 0x192   :  { %v1299_v55 = vadd.f32 %v2792_v42, %v1231_v53  ;;  %v1200_v56 = vld [vmem:[#allocation2 + $0xe8] sm:$0xff]  ;;  %1165 = vst.msk [vmem:[#allocation2 + $0x1e8] sm:$0xff] %vm19_vm2, %v1100_v52 }
 0x193   :  { %v1268_v58 = vadd.f32 %v2792_v42, %v1200_v56  ;;  %1134 = vst.msk [vmem:[#allocation2 + $0xf0] sm:$0xff] %vm19_vm2, %v1069_v54 }
 0x194   :  { %v1363_v49 = vmax.f32 %v1299_v55, 0.0 }
 0x195   :  { %v1332_v59 = vmax.f32 %v1268_v58, 0.0  ;;  %v865_v43 = vpop.f32.mrf.mxu2 }
 0x196   :  { %v1427_v62 = vpack.c.bf16 %v1363_v49, %v1363_v49  ;;  %v1035_v63 = vadd.f32 %v1034_v32, %v865_v43  ;;  %v787_v4 = vpop.f32.mrf.mxu0 }
 0x197   :  { %v959_v2 = vpop.f32.mrf.mxu1  ;;  %v1396_v7 = vpack.c.bf16 %v1332_v59, %v1332_v59  ;;  %v957_v8 = vadd.f32 %v956_v48, %v787_v4 }
 0x198   :  { %v960_v57 = vadd.f32 %v959_v2, %v2319_v6  ;;  %1492 = vst.msk [vmem:[%s2983_s3 + $0xf0] sm:$0xf] %vm1431_vm3, %v1427_v62  ;;  %v1101_v60 = vadd.f32 %v1035_v63, %v146_v61 }
 0x199   :  { %1461 = vst.msk [vmem:[%s2983_s3 + $0x74] sm:$0xf] %vm1431_vm3, %v1396_v7  ;;  %v1232_v9 = vld [vmem:[#allocation2 + $0x1e8] sm:$0xff]  ;;  %v1070_v12 = vadd.f32 %v957_v8, %v115_v3 }
 0x19a   :  { %v1071_v11 = vadd.f32 %v960_v57, %v116_v1  ;;  %v1300_v13 = vadd.f32 %v2792_v42, %v1232_v9  ;;  %v1201_v14 = vld [vmem:[#allocation2 + $0xf0] sm:$0xff]  ;;  %1166 = vst.msk [vmem:[#allocation2 + $0x1f0] sm:$0xff] %vm19_vm2, %v1101_v60 }
 0x19b   :  { %v1269_v6 = vadd.f32 %v2792_v42, %v1201_v14  ;;  %1135 = vst.msk [vmem:[#allocation2 + $0xf8] sm:$0xff] %vm19_vm2, %v1070_v12 }
 0x19c   :  { %1136 = vst.msk [vmem:[#allocation2 + $0x100] sm:$0xff] %vm19_vm2, %v1071_v11  ;;  %v1364_v16 = vmax.f32 %v1300_v13, 0.0 }
 0x19d   :  { %v1333_v17 = vmax.f32 %v1269_v6, 0.0  ;;  %v867_v20 = vpop.f32.mrf.mxu2 }
 0x19e   :  { %v1428_v21 = vpack.c.bf16 %v1364_v16, %v1364_v16  ;;  %v1037_v23 = vadd.f32 %v1036_v18, %v867_v20 }
 0x19f   :  { %v961_v24 = vpop.f32.mrf.mxu1  ;;  %v1397_v26 = vpack.c.bf16 %v1333_v17, %v1333_v17 }
 0x1a0   :  { %v962_v27 = vadd.f32 %v961_v24, %v2364_v22  ;;  %1493 = vst.msk [vmem:[%s2983_s3 + $0xf4] sm:$0xf] %vm1431_vm3, %v1428_v21  ;;  %v1102_v29 = vadd.f32 %v1037_v23, %v147_v19 }
 0x1a1   :  { %1462 = vst.msk [vmem:[%s2983_s3 + $0x78] sm:$0xf] %vm1431_vm3, %v1397_v26  ;;  %v1233_v30 = vld [vmem:[#allocation2 + $0x1f0] sm:$0xff] }
 0x1a2   :  { %v1072_v31 = vadd.f32 %v962_v27, %v117_v5  ;;  %v1301_v33 = vadd.f32 %v2792_v42, %v1233_v30  ;;  %1167 = vst.msk [vmem:[#allocation2 + $0x1f8] sm:$0xff] %vm19_vm2, %v1102_v29  ;;  %v1202_v34 = vld [vmem:[#allocation2 + $0xf8] sm:$0xff] }
 0x1a3   :  { %v1203_v0 = vld [vmem:[#allocation2 + $0x100] sm:$0xff]  ;;  %v1270_v35 = vadd.f32 %v2792_v42, %v1202_v34 }
 0x1a4   :  { %v1271_v22 = vadd.f32 %v2792_v42, %v1203_v0  ;;  %1137 = vst.msk [vmem:[#allocation2 + $0x108] sm:$0xff] %vm19_vm2, %v1072_v31  ;;  %v1365_v28 = vmax.f32 %v1301_v33, 0.0 }
 0x1a5   :  { %v1334_v38 = vmax.f32 %v1270_v35, 0.0 }
 0x1a6   :  { %v1335_v37 = vmax.f32 %v1271_v22, 0.0  ;;  %v1429_v15 = vpack.c.bf16 %v1365_v28, %v1365_v28 }
 0x1a7   :  { %v1398_v10 = vpack.c.bf16 %v1334_v38, %v1334_v38 }
 0x1a8   :  { %v1399_v39 = vpack.c.bf16 %v1335_v37, %v1335_v37  ;;  %1494 = vst.msk [vmem:[%s2983_s3 + $0xf8] sm:$0xf] %vm1431_vm3, %v1429_v15 }
 0x1a9   :  { %v1234_v40 = vld [vmem:[#allocation2 + $0x1f8] sm:$0xff]  ;;  %1463 = vst.msk [vmem:[%s2983_s3 + $0x7c] sm:$0xf] %vm1431_vm3, %v1398_v10 }
 0x1aa   :  { %1464 = vst.msk [vmem:[%s2983_s3 + $0x80] sm:$0xf] %vm1431_vm3, %v1399_v39  ;;  %v1302_v41 = vadd.f32 %v2792_v42, %v1234_v40 }
 0x1ab   :  { %v1204_v44 = vld [vmem:[#allocation2 + $0x108] sm:$0xff] }
 0x1ac   :  { %v1272_v46 = vadd.f32 %v2792_v42, %v1204_v44  ;;  %v1366_v47 = vmax.f32 %v1302_v41, 0.0 }
 0x1ae   :  { %v1336_v36 = vmax.f32 %v1272_v46, 0.0  ;;  %v1430_v48 = vpack.c.bf16 %v1366_v47, %v1366_v47 }
 0x1b0   :  { %v1400_v50 = vpack.c.bf16 %v1336_v36, %v1336_v36  ;;  %1495 = vst.msk [vmem:[%s2983_s3 + $0xfc] sm:$0xf] %vm1431_vm3, %v1430_v48 }
 0x1b2   :  { %1465 = vst.msk [vmem:[%s2983_s3 + $0x84] sm:$0xf] %vm1431_vm3, %v1400_v50 }

</bundles_post_ra>
